<compile_context>
chip_gen: v5e
topology: v5e:2x2
jax: 0.10.0
libtpu: 0.0.40
codegen_flags: <defaults>
</compile_context>

<pallas_src>
import math

import jax
import jax.numpy as jnp
from jax.experimental import pallas as pl
from jax.experimental.pallas import tpu as pltpu


def _silu(v):
    # exact silu: exp goes to the EUP, divide is full precision.
    return v / (1.0 + jnp.exp(-v))


def _softplus(v):
    # numerically stable softplus using only exp/log (EUP friendly)
    return jnp.maximum(v, 0.0) + jnp.log(1.0 + jnp.exp(-jnp.abs(v)))


def residual_mamba_kernel(
    x_ref,        # (1, LC, d_model)   raw input chunk (pre-norm) = residual
    rms_w_ref,    # (1, d_model)       RMSNorm weight
    w_in_ref,     # (d_model, 2*d_inner)   fused in_proj, transposed
    conv_w_ref,   # (d_conv, d_inner)      depthwise conv taps
    conv_b_ref,   # (1, d_inner)
    wx_ref,       # (d_inner, d_inner + 2*d_state)  fused [x_proj_dt@dt_proj | B | C]
    bdt_ref,      # (1, d_inner)       dt_proj bias
    a_neg_ref,    # (d_state, d_inner) precomputed -exp(A_log), transposed
    d_param_ref,  # (1, d_inner)
    w_out_ref,    # (d_inner, d_model) out_proj, transposed
    o_ref,        # (1, LC, d_model)
    conv_sc,      # VMEM (PAD + LC, d_inner)   padded conv input buffer
    tail_sc,      # VMEM (d_conv-1, d_inner)   conv tail carry (persistent)
    dA_sc,        # VMEM (LC, d_state, d_inner)
    bx_sc,        # VMEM (LC, d_state, d_inner)
    cm_sc,        # VMEM (LC, d_state, 1)
    y_sc,         # VMEM (LC, d_inner)
    h_sc,         # VMEM (d_state, d_inner)    scan state carry (persistent)
):
    li = pl.program_id(1)                       # chunk index along L
    LC = x_ref.shape[1]
    d_conv, d_inner = conv_w_ref.shape
    d_state = a_neg_ref.shape[0]
    KM1 = d_conv - 1
    PAD = conv_sc.shape[0] - LC                 # leading pad rows (8-aligned)
    GB = 8                                      # scan unroll / y-store group

    # reset persistent carries at the start of every batch row
    @pl.when(li == 0)
    def _():
        h_sc[...] = jnp.zeros_like(h_sc)
        tail_sc[...] = jnp.zeros_like(tail_sc)

    x_raw = x_ref[0].astype(jnp.float32)                      # (LC, d_model)

    # ---- RMSNorm ------------------------------------------------------------
    ms = jnp.mean(x_raw * x_raw, axis=-1, keepdims=True)
    xn = x_raw * jax.lax.rsqrt(ms + 1e-5) * rms_w_ref[...]

    # ---- fused in_proj (bias=False) -----------------------------------------
    xz = jnp.dot(xn.astype(w_in_ref.dtype), w_in_ref[...],
                 preferred_element_type=jnp.float32)          # (LC, 2*d_inner)
    xin = xz[:, :d_inner]
    z = xz[:, d_inner:]

    # ---- depthwise causal conv1d via padded scratch + static shifted reads ---
    conv_sc[PAD - KM1:PAD, :] = tail_sc[...]                  # previous-chunk tail
    conv_sc[PAD:, :] = xin                                    # aligned full-width store
    tail_sc[...] = xin[LC - KM1:, :]                          # carry for next chunk
    acc = conv_b_ref[...] + xin * conv_w_ref[KM1:KM1 + 1, :]  # tap k = d_conv-1
    for k in range(KM1):
        acc = acc + (conv_sc[PAD - KM1 + k:PAD - KM1 + k + LC, :]
                     * conv_w_ref[k:k + 1, :])
    xc = _silu(acc)                                           # (LC, d_inner)

    # ---- fused x_proj (dt_proj pre-folded) -> delta, B, C --------------------
    proj = jnp.dot(xc.astype(wx_ref.dtype), wx_ref[...],
                   preferred_element_type=jnp.float32)        # (LC, d_inner+2*d_state)
    delta = _softplus(proj[:, :d_inner] + bdt_ref[...])       # (LC, d_inner)
    Bm = proj[:, d_inner:d_inner + d_state]                   # (LC, d_state)
    Cm = proj[:, d_inner + d_state:]                          # (LC, d_state)

    a_neg = a_neg_ref[...]                                    # (d_state, d_inner)

    # ---- discretization for this chunk ---------------------------------------
    dA_sc[...] = jnp.exp(delta[:, None, :] * a_neg[None, :, :]).astype(dA_sc.dtype)
    bx_sc[...] = ((delta * xc)[:, None, :] * Bm[:, :, None]).astype(bx_sc.dtype)
    cm_sc[...] = Cm[:, :, None]                               # (LC, d_state, 1)

    # ---- selective scan: h lives in vregs, y stored per 8-row group ----------
    n_groups = LC // GB

    def group_body(g, h):
        g8 = pl.multiple_of(g * GB, GB)
        cm_grp = cm_sc[pl.ds(g8, GB)]                         # (GB, d_state, 1)
        ys = []
        for u in range(GB):                                   # unrolled
            h = dA_sc[g8 + u] * h + bx_sc[g8 + u]             # (d_state, d_inner)
            # y[t, c] = sum_n C[t, n] * h[n, c]
            ys.append(jnp.sum(h * cm_grp[u], axis=0, keepdims=True))
        y_sc[pl.ds(g8, GB), :] = jnp.concatenate(ys, axis=0)  # full-sublane store
        return h

    h_final = jax.lax.fori_loop(0, n_groups, group_body, h_sc[...])
    h_sc[...] = h_final                                       # one store per chunk

    # ---- gate, out_proj, residual --------------------------------------------
    y = y_sc[...] + d_param_ref[...] * xc                     # (LC, d_inner)
    out = jnp.dot((y * _silu(z)).astype(w_out_ref.dtype), w_out_ref[...],
                  preferred_element_type=jnp.float32)
    o_ref[0, :, :] = (out + x_raw).astype(o_ref.dtype)


def residual_block_forward(x, p, *, chunk=128, scan_dtype=jnp.float32):
    B, L, d_model = x.shape
    d_conv, d_inner = p["conv_w"].shape
    d_state = p["a_neg"].shape[0]

    LC = min(chunk, L)
    assert L % LC == 0, "sequence length must be divisible by the chunk size"
    assert LC % 8 == 0, "chunk size must be a multiple of 8"
    PAD = 8
    assert d_conv - 1 <= PAD and d_conv - 1 <= LC

    def const2d(shape):
        return pl.BlockSpec(shape, lambda b, l: (0, 0))

    in_specs = [
        pl.BlockSpec((1, LC, d_model), lambda b, l: (b, l, 0)),  # x (chunked)
        const2d((1, d_model)),                                   # rms_w
        const2d((d_model, 2 * d_inner)),                         # w_in_t (fused)
        const2d((d_conv, d_inner)),                              # conv_w
        const2d((1, d_inner)),                                   # conv_b
        const2d((d_inner, d_inner + 2 * d_state)),               # wx_fused
        const2d((1, d_inner)),                                   # bdt
        const2d((d_state, d_inner)),                             # a_neg
        const2d((1, d_inner)),                                   # D
        const2d((d_inner, d_model)),                             # w_out_t
    ]
    out_specs = pl.BlockSpec((1, LC, d_model), lambda b, l: (b, l, 0))
    scratch = [
        pltpu.VMEM((PAD + LC, d_inner), jnp.float32),            # padded conv buf
        pltpu.VMEM((d_conv - 1, d_inner), jnp.float32),          # conv tail carry
        pltpu.VMEM((LC, d_state, d_inner), scan_dtype),          # deltaA chunk
        pltpu.VMEM((LC, d_state, d_inner), scan_dtype),          # BX chunk
        pltpu.VMEM((LC, d_state, 1), jnp.float32),               # C chunk (column)
        pltpu.VMEM((LC, d_inner), jnp.float32),                  # y chunk
        pltpu.VMEM((d_state, d_inner), jnp.float32),             # h carry
    ]

    # ~96 MiB on 128-MiB parts (v5e/v6e), 48 MiB on v7x (64-MiB VMEM).
    try:
        cap = pltpu.get_tpu_info().vmem_capacity_bytes
        vmem_limit = int(min(100 * 1024 * 1024, (cap * 3) // 4))
    except Exception:
        vmem_limit = 48 * 1024 * 1024

    return pl.pallas_call(
        residual_mamba_kernel,
        out_shape=jax.ShapeDtypeStruct((B, L, d_model), jnp.float32),
        grid_spec=pltpu.PrefetchScalarGridSpec(
            num_scalar_prefetch=0,
            grid=(B, L // LC),
            in_specs=in_specs,
            out_specs=out_specs,
            scratch_shapes=scratch,
        ),
        compiler_params=pltpu.CompilerParams(
            # batch is independent -> megacore; chunk axis carries scan state
            dimension_semantics=("parallel", "arbitrary"),
            vmem_limit_bytes=vmem_limit,
        ),
    )(
        x, p["rms_w"], p["w_in_t"], p["conv_w"], p["conv_b"],
        p["wx_fused"], p["bdt"], p["a_neg"], p["d"], p["w_out_t"],
    )


# ---------------------------- parameter init (deterministic) -----------------
def init_raw_params(key, d_model, d_state=16, expand=2, d_conv=4, dt_rank=None,
                    dt_min=0.001, dt_max=0.1, dt_init_floor=1e-4):
    d_inner = expand * d_model
    if dt_rank is None:
        dt_rank = math.ceil(d_model / 16)
    ks = jax.random.split(key, 8)

    def lin_w(k, out_f, in_f):
        bound = 1.0 / math.sqrt(in_f)
        return jax.random.uniform(k, (out_f, in_f), jnp.float32, -bound, bound)

    w_in = lin_w(ks[0], 2 * d_inner, d_model)                      # in_proj
    cb = 1.0 / math.sqrt(d_conv)
    conv_w = jax.random.uniform(ks[1], (d_inner, d_conv), jnp.float32, -cb, cb)
    conv_b = jax.random.uniform(ks[2], (d_inner,), jnp.float32, -cb, cb)
    wx = lin_w(ks[3], dt_rank + 2 * d_state, d_inner)              # x_proj
    dt_init_std = dt_rank ** -0.5                                  # dt_scale = 1.0
    wdt = jax.random.uniform(ks[4], (d_inner, dt_rank), jnp.float32,
                             -dt_init_std, dt_init_std)
    dt = jnp.exp(jax.random.uniform(ks[5], (d_inner,), jnp.float32)
                 * (math.log(dt_max) - math.log(dt_min)) + math.log(dt_min))
    dt = jnp.maximum(dt, dt_init_floor)
    inv_dt = dt + jnp.log(-jnp.expm1(-dt))                         # dt_proj bias
    a_log = jnp.log(jnp.tile(
        jnp.arange(1, d_state + 1, dtype=jnp.float32)[None, :], (d_inner, 1)))
    d_param = jnp.ones((d_inner,), jnp.float32)
    w_out = lin_w(ks[6], d_model, d_inner)                         # out_proj
    rms_w = jnp.ones((d_model,), jnp.float32)

    return dict(rms_w=rms_w, w_in=w_in, conv_w=conv_w, conv_b=conv_b, wx=wx,
                wdt=wdt, bdt=inv_dt, a_log=a_log, D=d_param, w_out=w_out)


def pack_params(raw, dtype=jnp.float32):
    """Pre-transpose / pre-fuse params for the kernel.

    `dtype` applies to the three large matmul weights; use jnp.bfloat16 on
    v6e/v7x for the fast MXU path and half the weight VMEM.
    """
    d_inner, d_conv = raw["conv_w"].shape
    dt_rank = raw["wdt"].shape[1]
    d_state = raw["a_log"].shape[1]

    w_in_t = raw["w_in"].T                                   # (d_model, 2*d_inner)
    wx_t = raw["wx"].T                                       # (d_inner, dt_rank+2*d_state)
    wdt_t = raw["wdt"].T                                     # (dt_rank, d_inner)
    # fold dt_proj into the dt_rank slice of x_proj (low rank, exact)
    w_dt_fused = wx_t[:, :dt_rank] @ wdt_t                   # (d_inner, d_inner)
    wx_fused = jnp.concatenate(
        [w_dt_fused,
         wx_t[:, dt_rank:dt_rank + d_state],
         wx_t[:, dt_rank + d_state:]], axis=1)               # (d_inner, d_inner+2*d_state)

    return dict(
        rms_w=raw["rms_w"][None, :].astype(jnp.float32),
        w_in_t=w_in_t.astype(dtype),
        conv_w=raw["conv_w"].T.astype(jnp.float32),          # (d_conv, d_inner)
        conv_b=raw["conv_b"][None, :].astype(jnp.float32),
        wx_fused=wx_fused.astype(dtype),
        bdt=raw["bdt"][None, :].astype(jnp.float32),
        a_neg=(-jnp.exp(raw["a_log"])).T.astype(jnp.float32),  # (d_state, d_inner)
        d=raw["D"][None, :].astype(jnp.float32),
        w_out_t=raw["w_out"].T.astype(dtype),
    )


# ---------------------------- pure-JAX reference ------------------------------
def residual_block_ref(x, raw, eps=1e-5):
    d_inner, d_conv = raw["conv_w"].shape
    dt_rank = raw["wdt"].shape[1]
    d_state = raw["a_log"].shape[1]
    B, L, _ = x.shape

    xn = x * jax.lax.rsqrt(jnp.mean(x * x, axis=-1, keepdims=True) + eps) * raw["rms_w"]
    xz = xn @ raw["w_in"].T
    xi, z = xz[..., :d_inner], xz[..., d_inner:]

    xpad = jnp.pad(xi, ((0, 0), (d_conv - 1, 0), (0, 0)))
    conv = jnp.broadcast_to(raw["conv_b"][None, None, :], (B, L, d_inner)).astype(jnp.float32)
    for k in range(d_conv):
        conv = conv + xpad[:, k:k + L, :] * raw["conv_w"][:, k][None, None, :]
    xc = jax.nn.silu(conv)

    dbc = xc @ raw["wx"].T
    delta_r = dbc[..., :dt_rank]
    Bm = dbc[..., dt_rank:dt_rank + d_state]
    Cm = dbc[..., dt_rank + d_state:]
    delta = jax.nn.softplus(delta_r @ raw["wdt"].T + raw["bdt"])
    A = -jnp.exp(raw["a_log"])
    dA = jnp.exp(delta[..., None] * A[None, None])
    bx = (delta * xc)[..., None] * Bm[:, :, None, :]

    def step(h, inp):
        dA_t, bx_t = inp
        h = dA_t * h + bx_t
        return h, h

    h0 = jnp.zeros((B, d_inner, d_state), jnp.float32)
    _, hs = jax.lax.scan(step, h0, (dA.transpose(1, 0, 2, 3), bx.transpose(1, 0, 2, 3)))
    hs = hs.transpose(1, 0, 2, 3)
    y = jnp.sum(hs * Cm[:, :, None, :], axis=-1) + raw["D"][None, None] * xc
    out = (y * jax.nn.silu(z)) @ raw["w_out"].T
    return out + x


if __name__ == "__main__":
    d_model = 32
    d_state = 16
    expand = 2
    d_conv = 4
    B, L = 2, 8

    key = jax.random.PRNGKey(0)
    kx, kp = jax.random.split(key)
    raw = init_raw_params(kp, d_model, d_state=d_state, expand=expand, d_conv=d_conv)
    # keep f32 weights / f32 scan scratch for the tight correctness check; use
    # pack_params(raw, dtype=jnp.bfloat16) + scan_dtype=jnp.bfloat16 on v6e/v7x.
    params = pack_params(raw)
    x = jax.random.normal(kx, (B, L, d_model), jnp.float32)

    out = residual_block_forward(x, params)
    out = jax.block_until_ready(out)

    ref = residual_block_ref(x, raw)
    assert out.shape == (B, L, d_model)
    err = float(jnp.max(jnp.abs(out - ref)))
    assert err < 2e-3, f"max abs error too large: {err}"
    print("KERNEL_OK")
</pallas_src>

<mosaic_0001>
module attributes {stable_mosaic.version = 11 : i64} {
  func.func @residual_mamba_kernel(%arg0: i32, %arg1: i32, %arg2: memref<1x8x32xf32, #tpu.memory_space<vmem>>, %arg3: memref<1x32xf32, #tpu.memory_space<vmem>>, %arg4: memref<32x128xf32, #tpu.memory_space<vmem>>, %arg5: memref<4x64xf32, #tpu.memory_space<vmem>>, %arg6: memref<1x64xf32, #tpu.memory_space<vmem>>, %arg7: memref<64x96xf32, #tpu.memory_space<vmem>>, %arg8: memref<1x64xf32, #tpu.memory_space<vmem>>, %arg9: memref<16x64xf32, #tpu.memory_space<vmem>>, %arg10: memref<1x64xf32, #tpu.memory_space<vmem>>, %arg11: memref<64x32xf32, #tpu.memory_space<vmem>>, %arg12: memref<1x8x32xf32, #tpu.memory_space<vmem>>, %arg13: memref<16x64xf32, #tpu.memory_space<vmem>>, %arg14: memref<3x64xf32, #tpu.memory_space<vmem>>, %arg15: memref<8x16x64xf32, #tpu.memory_space<vmem>>, %arg16: memref<8x16x64xf32, #tpu.memory_space<vmem>>, %arg17: memref<8x16x1xf32, #tpu.memory_space<vmem>>, %arg18: memref<8x64xf32, #tpu.memory_space<vmem>>, %arg19: memref<16x64xf32, #tpu.memory_space<vmem>>) attributes {dimension_semantics = [#tpu.dimension_semantics<parallel>, #tpu.dimension_semantics<arbitrary>], iteration_bounds = array<i64: 2, 1>, scalar_prefetch = 0 : i64, scratch_operands = 7 : i64, tpu.core_type = #tpu.core_type<tc>, window_params = [{transform_indices = @transform_0, window_bounds = array<i64: 1, 8, 32>}, {pipeline_mode = #tpu.pipeline_mode<synchronous>, transform_indices = @transform_1, window_bounds = array<i64: 1, 32>}, {pipeline_mode = #tpu.pipeline_mode<synchronous>, transform_indices = @transform_2, window_bounds = array<i64: 32, 128>}, {pipeline_mode = #tpu.pipeline_mode<synchronous>, transform_indices = @transform_3, window_bounds = array<i64: 4, 64>}, {pipeline_mode = #tpu.pipeline_mode<synchronous>, transform_indices = @transform_4, window_bounds = array<i64: 1, 64>}, {pipeline_mode = #tpu.pipeline_mode<synchronous>, transform_indices = @transform_5, window_bounds = array<i64: 64, 96>}, {pipeline_mode = #tpu.pipeline_mode<synchronous>, transform_indices = @transform_6, window_bounds = array<i64: 1, 64>}, {pipeline_mode = #tpu.pipeline_mode<synchronous>, transform_indices = @transform_7, window_bounds = array<i64: 16, 64>}, {pipeline_mode = #tpu.pipeline_mode<synchronous>, transform_indices = @transform_8, window_bounds = array<i64: 1, 64>}, {pipeline_mode = #tpu.pipeline_mode<synchronous>, transform_indices = @transform_9, window_bounds = array<i64: 64, 32>}, {transform_indices = @transform_10, window_bounds = array<i64: 1, 8, 32>}]} {
    %c0_i32 = arith.constant 0 : i32
    %0 = arith.cmpi eq, %arg1, %c0_i32 : i32
    %1 = arith.extui %0 : i1 to i32
    %c0_i32_0 = arith.constant 0 : i32
    %2 = arith.cmpi ne, %1, %c0_i32_0 : i32
    scf.if %2 {
      %cst_118 = arith.constant 0.000000e+00 : f32
      %244 = vector.broadcast %cst_118 : f32 to vector<16x64xf32>
      %c0_119 = arith.constant 0 : index
      %c0_120 = arith.constant 0 : index
      %245 = vector.load %arg19[%c0_119, %c0_120] : memref<16x64xf32, #tpu.memory_space<vmem>>, vector<16x64xf32>
      tpu.vector_store %arg19[%c0_119, %c0_120], %244 {strides = array<i32>} : memref<16x64xf32, #tpu.memory_space<vmem>>, vector<16x64xf32>,
      %cst_121 = arith.constant 0.000000e+00 : f32
      %246 = vector.broadcast %cst_121 : f32 to vector<3x64xf32>
      %c0_122 = arith.constant 0 : index
      %c0_123 = arith.constant 0 : index
      %247 = vector.load %arg14[%c0_122, %c0_123] : memref<3x64xf32, #tpu.memory_space<vmem>>, vector<3x64xf32>
      tpu.vector_store %arg14[%c0_122, %c0_123], %246 {strides = array<i32>} : memref<3x64xf32, #tpu.memory_space<vmem>>, vector<3x64xf32>,
    } else {
    }
    %c0 = arith.constant 0 : index
    %c0_1 = arith.constant 0 : index
    %c0_2 = arith.constant 0 : index
    %3 = vector.load %arg2[%c0, %c0_1, %c0_2] : memref<1x8x32xf32, #tpu.memory_space<vmem>>, vector<1x8x32xf32>
    %4 = vector.shape_cast %3 : vector<1x8x32xf32> to vector<8x32xf32>
    %5 = arith.mulf %4, %4 : vector<8x32xf32>
    %cst = arith.constant dense<0.000000e+00> : vector<8xf32>
    %6 = vector.multi_reduction <add>, %5, %cst [1] : vector<8x32xf32> to vector<8xf32>
    %7 = vector.shape_cast %6 : vector<8xf32> to vector<8x1xf32>
    %cst_3 = arith.constant 3.200000e+01 : f32
    %8 = vector.broadcast %cst_3 : f32 to vector<8x1xf32>
    %9 = arith.divf %7, %8 : vector<8x1xf32>
    %cst_4 = arith.constant 9.99999974E-6 : f32
    %10 = vector.broadcast %cst_4 : f32 to vector<8x1xf32>
    %11 = arith.addf %9, %10 : vector<8x1xf32>
    %12 = math.rsqrt %11 : vector<8x1xf32>
    %13 = vector.broadcast %12 : vector<8x1xf32> to vector<8x32xf32>
    %14 = arith.mulf %4, %13 : vector<8x32xf32>
    %c0_5 = arith.constant 0 : index
    %c0_6 = arith.constant 0 : index
    %15 = vector.load %arg3[%c0_5, %c0_6] : memref<1x32xf32, #tpu.memory_space<vmem>>, vector<1x32xf32>
    %16 = vector.broadcast %15 : vector<1x32xf32> to vector<8x32xf32>
    %17 = arith.mulf %14, %16 : vector<8x32xf32>
    %c0_7 = arith.constant 0 : index
    %c0_8 = arith.constant 0 : index
    %18 = vector.load %arg4[%c0_7, %c0_8] : memref<32x128xf32, #tpu.memory_space<vmem>>, vector<32x128xf32>
    %cst_9 = arith.constant dense<0.000000e+00> : vector<8x128xf32>
    %19 = tpu.matmul %17, %18, %cst_9 {dimension_numbers = #tpu.dot_dimension_numbers<[1], [0], [0], [1], [0, 0, 1, 1], [], []>} : vector<8x32xf32>, vector<32x128xf32>, vector<8x128xf32> -> vector<8x128xf32>
    %20 = vector.extract_strided_slice %19 {offsets = [0, 0], sizes = [8, 64], strides = [1, 1]} : vector<8x128xf32> to vector<8x64xf32>
    %21 = vector.extract_strided_slice %19 {offsets = [0, 64], sizes = [8, 64], strides = [1, 1]} : vector<8x128xf32> to vector<8x64xf32>
    %c0_10 = arith.constant 0 : index
    %c0_11 = arith.constant 0 : index
    %22 = vector.load %arg14[%c0_10, %c0_11] : memref<3x64xf32, #tpu.memory_space<vmem>>, vector<3x64xf32>
    %c5 = arith.constant 5 : index
    %c0_12 = arith.constant 0 : index
    %23 = vector.load %arg13[%c5, %c0_12] : memref<16x64xf32, #tpu.memory_space<vmem>>, vector<3x64xf32>
    tpu.vector_store %arg13[%c5, %c0_12], %22 {strides = array<i32>} : memref<16x64xf32, #tpu.memory_space<vmem>>, vector<3x64xf32>,
    %c8 = arith.constant 8 : index
    %c0_13 = arith.constant 0 : index
    %24 = vector.load %arg13[%c8, %c0_13] : memref<16x64xf32, #tpu.memory_space<vmem>>, vector<8x64xf32>
    tpu.vector_store %arg13[%c8, %c0_13], %20 {strides = array<i32>} : memref<16x64xf32, #tpu.memory_space<vmem>>, vector<8x64xf32>,
    %25 = vector.extract_strided_slice %20 {offsets = [5, 0], sizes = [3, 64], strides = [1, 1]} : vector<8x64xf32> to vector<3x64xf32>
    %c0_14 = arith.constant 0 : index
    %c0_15 = arith.constant 0 : index
    %26 = vector.load %arg14[%c0_14, %c0_15] : memref<3x64xf32, #tpu.memory_space<vmem>>, vector<3x64xf32>
    tpu.vector_store %arg14[%c0_14, %c0_15], %25 {strides = array<i32>} : memref<3x64xf32, #tpu.memory_space<vmem>>, vector<3x64xf32>,
    %c0_16 = arith.constant 0 : index
    %c0_17 = arith.constant 0 : index
    %27 = vector.load %arg6[%c0_16, %c0_17] : memref<1x64xf32, #tpu.memory_space<vmem>>, vector<1x64xf32>
    %c3 = arith.constant 3 : index
    %c0_18 = arith.constant 0 : index
    %28 = vector.load %arg5[%c3, %c0_18] : memref<4x64xf32, #tpu.memory_space<vmem>>, vector<1x64xf32>
    %29 = vector.broadcast %28 : vector<1x64xf32> to vector<8x64xf32>
    %30 = arith.mulf %20, %29 : vector<8x64xf32>
    %31 = vector.broadcast %27 : vector<1x64xf32> to vector<8x64xf32>
    %32 = arith.addf %31, %30 : vector<8x64xf32>
    %c5_19 = arith.constant 5 : index
    %c0_20 = arith.constant 0 : index
    %33 = vector.load %arg13[%c5_19, %c0_20] : memref<16x64xf32, #tpu.memory_space<vmem>>, vector<8x64xf32>
    %c0_21 = arith.constant 0 : index
    %c0_22 = arith.constant 0 : index
    %34 = vector.load %arg5[%c0_21, %c0_22] : memref<4x64xf32, #tpu.memory_space<vmem>>, vector<1x64xf32>
    %35 = vector.broadcast %34 : vector<1x64xf32> to vector<8x64xf32>
    %36 = arith.mulf %33, %35 : vector<8x64xf32>
    %37 = arith.addf %32, %36 : vector<8x64xf32>
    %c6 = arith.constant 6 : index
    %c0_23 = arith.constant 0 : index
    %38 = vector.load %arg13[%c6, %c0_23] : memref<16x64xf32, #tpu.memory_space<vmem>>, vector<8x64xf32>
    %c1 = arith.constant 1 : index
    %c0_24 = arith.constant 0 : index
    %39 = vector.load %arg5[%c1, %c0_24] : memref<4x64xf32, #tpu.memory_space<vmem>>, vector<1x64xf32>
    %40 = vector.broadcast %39 : vector<1x64xf32> to vector<8x64xf32>
    %41 = arith.mulf %38, %40 : vector<8x64xf32>
    %42 = arith.addf %37, %41 : vector<8x64xf32>
    %c7 = arith.constant 7 : index
    %c0_25 = arith.constant 0 : index
    %43 = vector.load %arg13[%c7, %c0_25] : memref<16x64xf32, #tpu.memory_space<vmem>>, vector<8x64xf32>
    %c2 = arith.constant 2 : index
    %c0_26 = arith.constant 0 : index
    %44 = vector.load %arg5[%c2, %c0_26] : memref<4x64xf32, #tpu.memory_space<vmem>>, vector<1x64xf32>
    %45 = vector.broadcast %44 : vector<1x64xf32> to vector<8x64xf32>
    %46 = arith.mulf %43, %45 : vector<8x64xf32>
    %47 = arith.addf %42, %46 : vector<8x64xf32>
    %cst_27 = arith.constant 0.000000e+00 : f32
    %48 = vector.broadcast %cst_27 : f32 to vector<8x64xf32>
    %49 = arith.subf %48, %47 : vector<8x64xf32>
    %50 = math.exp %49 : vector<8x64xf32>
    %cst_28 = arith.constant 1.000000e+00 : f32
    %51 = vector.broadcast %cst_28 : f32 to vector<8x64xf32>
    %52 = arith.addf %51, %50 : vector<8x64xf32>
    %53 = arith.divf %47, %52 : vector<8x64xf32>
    %c0_29 = arith.constant 0 : index
    %c0_30 = arith.constant 0 : index
    %54 = vector.load %arg7[%c0_29, %c0_30] : memref<64x96xf32, #tpu.memory_space<vmem>>, vector<64x96xf32>
    %cst_31 = arith.constant dense<0.000000e+00> : vector<8x96xf32>
    %55 = tpu.matmul %53, %54, %cst_31 {dimension_numbers = #tpu.dot_dimension_numbers<[1], [0], [0], [1], [0, 0, 1, 1], [], []>} : vector<8x64xf32>, vector<64x96xf32>, vector<8x96xf32> -> vector<8x96xf32>
    %56 = vector.extract_strided_slice %55 {offsets = [0, 0], sizes = [8, 64], strides = [1, 1]} : vector<8x96xf32> to vector<8x64xf32>
    %c0_32 = arith.constant 0 : index
    %c0_33 = arith.constant 0 : index
    %57 = vector.load %arg8[%c0_32, %c0_33] : memref<1x64xf32, #tpu.memory_space<vmem>>, vector<1x64xf32>
    %58 = vector.broadcast %57 : vector<1x64xf32> to vector<8x64xf32>
    %59 = arith.addf %56, %58 : vector<8x64xf32>
    %cst_34 = arith.constant 0.000000e+00 : f32
    %60 = vector.broadcast %cst_34 : f32 to vector<8x64xf32>
    %61 = arith.maximumf %59, %60 : vector<8x64xf32>
    %62 = math.absf %59 : vector<8x64xf32>
    %cst_35 = arith.constant 0.000000e+00 : f32
    %63 = vector.broadcast %cst_35 : f32 to vector<8x64xf32>
    %64 = arith.subf %63, %62 : vector<8x64xf32>
    %65 = math.exp %64 : vector<8x64xf32>
    %cst_36 = arith.constant 1.000000e+00 : f32
    %66 = vector.broadcast %cst_36 : f32 to vector<8x64xf32>
    %67 = arith.addf %66, %65 : vector<8x64xf32>
    %68 = math.log %67 : vector<8x64xf32>
    %69 = arith.addf %61, %68 : vector<8x64xf32>
    %70 = vector.extract_strided_slice %55 {offsets = [0, 64], sizes = [8, 16], strides = [1, 1]} : vector<8x96xf32> to vector<8x16xf32>
    %71 = vector.extract_strided_slice %55 {offsets = [0, 80], sizes = [8, 16], strides = [1, 1]} : vector<8x96xf32> to vector<8x16xf32>
    %c0_37 = arith.constant 0 : index
    %c0_38 = arith.constant 0 : index
    %72 = vector.load %arg9[%c0_37, %c0_38] : memref<16x64xf32, #tpu.memory_space<vmem>>, vector<16x64xf32>
    %73 = vector.shape_cast %69 : vector<8x64xf32> to vector<8x1x64xf32>
    %74 = vector.shape_cast %72 : vector<16x64xf32> to vector<1x16x64xf32>
    %75 = vector.broadcast %73 : vector<8x1x64xf32> to vector<8x16x64xf32>
    %76 = vector.broadcast %74 : vector<1x16x64xf32> to vector<8x16x64xf32>
    %77 = arith.mulf %75, %76 : vector<8x16x64xf32>
    %78 = math.exp %77 : vector<8x16x64xf32>
    %c0_39 = arith.constant 0 : index
    %c0_40 = arith.constant 0 : index
    %c0_41 = arith.constant 0 : index
    %79 = vector.load %arg15[%c0_39, %c0_40, %c0_41] : memref<8x16x64xf32, #tpu.memory_space<vmem>>, vector<8x16x64xf32>
    tpu.vector_store %arg15[%c0_39, %c0_40, %c0_41], %78 {strides = array<i32>} : memref<8x16x64xf32, #tpu.memory_space<vmem>>, vector<8x16x64xf32>,
    %80 = arith.mulf %69, %53 : vector<8x64xf32>
    %81 = vector.shape_cast %80 : vector<8x64xf32> to vector<8x1x64xf32>
    %82 = vector.shape_cast %70 : vector<8x16xf32> to vector<8x16x1xf32>
    %83 = vector.broadcast %81 : vector<8x1x64xf32> to vector<8x16x64xf32>
    %84 = vector.broadcast %82 : vector<8x16x1xf32> to vector<8x16x64xf32>
    %85 = arith.mulf %83, %84 : vector<8x16x64xf32>
    %c0_42 = arith.constant 0 : index
    %c0_43 = arith.constant 0 : index
    %c0_44 = arith.constant 0 : index
    %86 = vector.load %arg16[%c0_42, %c0_43, %c0_44] : memref<8x16x64xf32, #tpu.memory_space<vmem>>, vector<8x16x64xf32>
    tpu.vector_store %arg16[%c0_42, %c0_43, %c0_44], %85 {strides = array<i32>} : memref<8x16x64xf32, #tpu.memory_space<vmem>>, vector<8x16x64xf32>,
    %87 = vector.shape_cast %71 : vector<8x16xf32> to vector<8x16x1xf32>
    %c0_45 = arith.constant 0 : index
    %c0_46 = arith.constant 0 : index
    %c0_47 = arith.constant 0 : index
    %88 = vector.load %arg17[%c0_45, %c0_46, %c0_47] : memref<8x16x1xf32, #tpu.memory_space<vmem>>, vector<8x16x1xf32>
    tpu.vector_store %arg17[%c0_45, %c0_46, %c0_47], %87 {strides = array<i32>} : memref<8x16x1xf32, #tpu.memory_space<vmem>>, vector<8x16x1xf32>,
    %c0_48 = arith.constant 0 : index
    %c0_49 = arith.constant 0 : index
    %89 = vector.load %arg19[%c0_48, %c0_49] : memref<16x64xf32, #tpu.memory_space<vmem>>, vector<16x64xf32>
    %c0_i32_50 = arith.constant 0 : i32
    %c8_i32 = arith.constant 8 : i32
    %90 = arith.muli %c0_i32_50, %c8_i32 : i32
    %91 = tpu.assume_multiple %90, 8 : i32
    %92 = arith.index_cast %91 : i32 to index
    %c0_51 = arith.constant 0 : index
    %c0_52 = arith.constant 0 : index
    %93 = vector.load %arg17[%92, %c0_51, %c0_52] : memref<8x16x1xf32, #tpu.memory_space<vmem>>, vector<8x16x1xf32>
    %c0_i32_53 = arith.constant 0 : i32
    %94 = arith.addi %91, %c0_i32_53 : i32
    %95 = arith.index_cast %94 : i32 to index
    %c0_54 = arith.constant 0 : index
    %c0_55 = arith.constant 0 : index
    %96 = vector.load %arg15[%95, %c0_54, %c0_55] : memref<8x16x64xf32, #tpu.memory_space<vmem>>, vector<1x16x64xf32>
    %97 = vector.shape_cast %96 : vector<1x16x64xf32> to vector<16x64xf32>
    %98 = arith.mulf %97, %89 : vector<16x64xf32>
    %c0_i32_56 = arith.constant 0 : i32
    %99 = arith.addi %91, %c0_i32_56 : i32
    %100 = arith.index_cast %99 : i32 to index
    %c0_57 = arith.constant 0 : index
    %c0_58 = arith.constant 0 : index
    %101 = vector.load %arg16[%100, %c0_57, %c0_58] : memref<8x16x64xf32, #tpu.memory_space<vmem>>, vector<1x16x64xf32>
    %102 = vector.shape_cast %101 : vector<1x16x64xf32> to vector<16x64xf32>
    %103 = arith.addf %98, %102 : vector<16x64xf32>
    %104 = vector.extract_strided_slice %93 {offsets = [0, 0, 0], sizes = [1, 16, 1], strides = [1, 1, 1]} : vector<8x16x1xf32> to vector<1x16x1xf32>
    %105 = vector.shape_cast %104 : vector<1x16x1xf32> to vector<16x1xf32>
    %106 = vector.broadcast %105 : vector<16x1xf32> to vector<16x64xf32>
    %107 = arith.mulf %103, %106 : vector<16x64xf32>
    %cst_59 = arith.constant dense<0.000000e+00> : vector<64xf32>
    %108 = vector.multi_reduction <add>, %107, %cst_59 [0] : vector<16x64xf32> to vector<64xf32>
    %109 = vector.shape_cast %108 : vector<64xf32> to vector<1x64xf32>
    %c1_i32 = arith.constant 1 : i32
    %110 = arith.addi %91, %c1_i32 : i32
    %111 = arith.index_cast %110 : i32 to index
    %c0_60 = arith.constant 0 : index
    %c0_61 = arith.constant 0 : index
    %112 = vector.load %arg15[%111, %c0_60, %c0_61] : memref<8x16x64xf32, #tpu.memory_space<vmem>>, vector<1x16x64xf32>
    %113 = vector.shape_cast %112 : vector<1x16x64xf32> to vector<16x64xf32>
    %114 = arith.mulf %113, %103 : vector<16x64xf32>
    %c1_i32_62 = arith.constant 1 : i32
    %115 = arith.addi %91, %c1_i32_62 : i32
    %116 = arith.index_cast %115 : i32 to index
    %c0_63 = arith.constant 0 : index
    %c0_64 = arith.constant 0 : index
    %117 = vector.load %arg16[%116, %c0_63, %c0_64] : memref<8x16x64xf32, #tpu.memory_space<vmem>>, vector<1x16x64xf32>
    %118 = vector.shape_cast %117 : vector<1x16x64xf32> to vector<16x64xf32>
    %119 = arith.addf %114, %118 : vector<16x64xf32>
    %120 = vector.extract_strided_slice %93 {offsets = [1, 0, 0], sizes = [1, 16, 1], strides = [1, 1, 1]} : vector<8x16x1xf32> to vector<1x16x1xf32>
    %121 = vector.shape_cast %120 : vector<1x16x1xf32> to vector<16x1xf32>
    %122 = vector.broadcast %121 : vector<16x1xf32> to vector<16x64xf32>
    %123 = arith.mulf %119, %122 : vector<16x64xf32>
    %cst_65 = arith.constant dense<0.000000e+00> : vector<64xf32>
    %124 = vector.multi_reduction <add>, %123, %cst_65 [0] : vector<16x64xf32> to vector<64xf32>
    %125 = vector.shape_cast %124 : vector<64xf32> to vector<1x64xf32>
    %c2_i32 = arith.constant 2 : i32
    %126 = arith.addi %91, %c2_i32 : i32
    %127 = arith.index_cast %126 : i32 to index
    %c0_66 = arith.constant 0 : index
    %c0_67 = arith.constant 0 : index
    %128 = vector.load %arg15[%127, %c0_66, %c0_67] : memref<8x16x64xf32, #tpu.memory_space<vmem>>, vector<1x16x64xf32>
    %129 = vector.shape_cast %128 : vector<1x16x64xf32> to vector<16x64xf32>
    %130 = arith.mulf %129, %119 : vector<16x64xf32>
    %c2_i32_68 = arith.constant 2 : i32
    %131 = arith.addi %91, %c2_i32_68 : i32
    %132 = arith.index_cast %131 : i32 to index
    %c0_69 = arith.constant 0 : index
    %c0_70 = arith.constant 0 : index
    %133 = vector.load %arg16[%132, %c0_69, %c0_70] : memref<8x16x64xf32, #tpu.memory_space<vmem>>, vector<1x16x64xf32>
    %134 = vector.shape_cast %133 : vector<1x16x64xf32> to vector<16x64xf32>
    %135 = arith.addf %130, %134 : vector<16x64xf32>
    %136 = vector.extract_strided_slice %93 {offsets = [2, 0, 0], sizes = [1, 16, 1], strides = [1, 1, 1]} : vector<8x16x1xf32> to vector<1x16x1xf32>
    %137 = vector.shape_cast %136 : vector<1x16x1xf32> to vector<16x1xf32>
    %138 = vector.broadcast %137 : vector<16x1xf32> to vector<16x64xf32>
    %139 = arith.mulf %135, %138 : vector<16x64xf32>
    %cst_71 = arith.constant dense<0.000000e+00> : vector<64xf32>
    %140 = vector.multi_reduction <add>, %139, %cst_71 [0] : vector<16x64xf32> to vector<64xf32>
    %141 = vector.shape_cast %140 : vector<64xf32> to vector<1x64xf32>
    %c3_i32 = arith.constant 3 : i32
    %142 = arith.addi %91, %c3_i32 : i32
    %143 = arith.index_cast %142 : i32 to index
    %c0_72 = arith.constant 0 : index
    %c0_73 = arith.constant 0 : index
    %144 = vector.load %arg15[%143, %c0_72, %c0_73] : memref<8x16x64xf32, #tpu.memory_space<vmem>>, vector<1x16x64xf32>
    %145 = vector.shape_cast %144 : vector<1x16x64xf32> to vector<16x64xf32>
    %146 = arith.mulf %145, %135 : vector<16x64xf32>
    %c3_i32_74 = arith.constant 3 : i32
    %147 = arith.addi %91, %c3_i32_74 : i32
    %148 = arith.index_cast %147 : i32 to index
    %c0_75 = arith.constant 0 : index
    %c0_76 = arith.constant 0 : index
    %149 = vector.load %arg16[%148, %c0_75, %c0_76] : memref<8x16x64xf32, #tpu.memory_space<vmem>>, vector<1x16x64xf32>
    %150 = vector.shape_cast %149 : vector<1x16x64xf32> to vector<16x64xf32>
    %151 = arith.addf %146, %150 : vector<16x64xf32>
    %152 = vector.extract_strided_slice %93 {offsets = [3, 0, 0], sizes = [1, 16, 1], strides = [1, 1, 1]} : vector<8x16x1xf32> to vector<1x16x1xf32>
    %153 = vector.shape_cast %152 : vector<1x16x1xf32> to vector<16x1xf32>
    %154 = vector.broadcast %153 : vector<16x1xf32> to vector<16x64xf32>
    %155 = arith.mulf %151, %154 : vector<16x64xf32>
    %cst_77 = arith.constant dense<0.000000e+00> : vector<64xf32>
    %156 = vector.multi_reduction <add>, %155, %cst_77 [0] : vector<16x64xf32> to vector<64xf32>
    %157 = vector.shape_cast %156 : vector<64xf32> to vector<1x64xf32>
    %c4_i32 = arith.constant 4 : i32
    %158 = arith.addi %91, %c4_i32 : i32
    %159 = arith.index_cast %158 : i32 to index
    %c0_78 = arith.constant 0 : index
    %c0_79 = arith.constant 0 : index
    %160 = vector.load %arg15[%159, %c0_78, %c0_79] : memref<8x16x64xf32, #tpu.memory_space<vmem>>, vector<1x16x64xf32>
    %161 = vector.shape_cast %160 : vector<1x16x64xf32> to vector<16x64xf32>
    %162 = arith.mulf %161, %151 : vector<16x64xf32>
    %c4_i32_80 = arith.constant 4 : i32
    %163 = arith.addi %91, %c4_i32_80 : i32
    %164 = arith.index_cast %163 : i32 to index
    %c0_81 = arith.constant 0 : index
    %c0_82 = arith.constant 0 : index
    %165 = vector.load %arg16[%164, %c0_81, %c0_82] : memref<8x16x64xf32, #tpu.memory_space<vmem>>, vector<1x16x64xf32>
    %166 = vector.shape_cast %165 : vector<1x16x64xf32> to vector<16x64xf32>
    %167 = arith.addf %162, %166 : vector<16x64xf32>
    %168 = vector.extract_strided_slice %93 {offsets = [4, 0, 0], sizes = [1, 16, 1], strides = [1, 1, 1]} : vector<8x16x1xf32> to vector<1x16x1xf32>
    %169 = vector.shape_cast %168 : vector<1x16x1xf32> to vector<16x1xf32>
    %170 = vector.broadcast %169 : vector<16x1xf32> to vector<16x64xf32>
    %171 = arith.mulf %167, %170 : vector<16x64xf32>
    %cst_83 = arith.constant dense<0.000000e+00> : vector<64xf32>
    %172 = vector.multi_reduction <add>, %171, %cst_83 [0] : vector<16x64xf32> to vector<64xf32>
    %173 = vector.shape_cast %172 : vector<64xf32> to vector<1x64xf32>
    %c5_i32 = arith.constant 5 : i32
    %174 = arith.addi %91, %c5_i32 : i32
    %175 = arith.index_cast %174 : i32 to index
    %c0_84 = arith.constant 0 : index
    %c0_85 = arith.constant 0 : index
    %176 = vector.load %arg15[%175, %c0_84, %c0_85] : memref<8x16x64xf32, #tpu.memory_space<vmem>>, vector<1x16x64xf32>
    %177 = vector.shape_cast %176 : vector<1x16x64xf32> to vector<16x64xf32>
    %178 = arith.mulf %177, %167 : vector<16x64xf32>
    %c5_i32_86 = arith.constant 5 : i32
    %179 = arith.addi %91, %c5_i32_86 : i32
    %180 = arith.index_cast %179 : i32 to index
    %c0_87 = arith.constant 0 : index
    %c0_88 = arith.constant 0 : index
    %181 = vector.load %arg16[%180, %c0_87, %c0_88] : memref<8x16x64xf32, #tpu.memory_space<vmem>>, vector<1x16x64xf32>
    %182 = vector.shape_cast %181 : vector<1x16x64xf32> to vector<16x64xf32>
    %183 = arith.addf %178, %182 : vector<16x64xf32>
    %184 = vector.extract_strided_slice %93 {offsets = [5, 0, 0], sizes = [1, 16, 1], strides = [1, 1, 1]} : vector<8x16x1xf32> to vector<1x16x1xf32>
    %185 = vector.shape_cast %184 : vector<1x16x1xf32> to vector<16x1xf32>
    %186 = vector.broadcast %185 : vector<16x1xf32> to vector<16x64xf32>
    %187 = arith.mulf %183, %186 : vector<16x64xf32>
    %cst_89 = arith.constant dense<0.000000e+00> : vector<64xf32>
    %188 = vector.multi_reduction <add>, %187, %cst_89 [0] : vector<16x64xf32> to vector<64xf32>
    %189 = vector.shape_cast %188 : vector<64xf32> to vector<1x64xf32>
    %c6_i32 = arith.constant 6 : i32
    %190 = arith.addi %91, %c6_i32 : i32
    %191 = arith.index_cast %190 : i32 to index
    %c0_90 = arith.constant 0 : index
    %c0_91 = arith.constant 0 : index
    %192 = vector.load %arg15[%191, %c0_90, %c0_91] : memref<8x16x64xf32, #tpu.memory_space<vmem>>, vector<1x16x64xf32>
    %193 = vector.shape_cast %192 : vector<1x16x64xf32> to vector<16x64xf32>
    %194 = arith.mulf %193, %183 : vector<16x64xf32>
    %c6_i32_92 = arith.constant 6 : i32
    %195 = arith.addi %91, %c6_i32_92 : i32
    %196 = arith.index_cast %195 : i32 to index
    %c0_93 = arith.constant 0 : index
    %c0_94 = arith.constant 0 : index
    %197 = vector.load %arg16[%196, %c0_93, %c0_94] : memref<8x16x64xf32, #tpu.memory_space<vmem>>, vector<1x16x64xf32>
    %198 = vector.shape_cast %197 : vector<1x16x64xf32> to vector<16x64xf32>
    %199 = arith.addf %194, %198 : vector<16x64xf32>
    %200 = vector.extract_strided_slice %93 {offsets = [6, 0, 0], sizes = [1, 16, 1], strides = [1, 1, 1]} : vector<8x16x1xf32> to vector<1x16x1xf32>
    %201 = vector.shape_cast %200 : vector<1x16x1xf32> to vector<16x1xf32>
    %202 = vector.broadcast %201 : vector<16x1xf32> to vector<16x64xf32>
    %203 = arith.mulf %199, %202 : vector<16x64xf32>
    %cst_95 = arith.constant dense<0.000000e+00> : vector<64xf32>
    %204 = vector.multi_reduction <add>, %203, %cst_95 [0] : vector<16x64xf32> to vector<64xf32>
    %205 = vector.shape_cast %204 : vector<64xf32> to vector<1x64xf32>
    %c7_i32 = arith.constant 7 : i32
    %206 = arith.addi %91, %c7_i32 : i32
    %207 = arith.index_cast %206 : i32 to index
    %c0_96 = arith.constant 0 : index
    %c0_97 = arith.constant 0 : index
    %208 = vector.load %arg15[%207, %c0_96, %c0_97] : memref<8x16x64xf32, #tpu.memory_space<vmem>>, vector<1x16x64xf32>
    %209 = vector.shape_cast %208 : vector<1x16x64xf32> to vector<16x64xf32>
    %210 = arith.mulf %209, %199 : vector<16x64xf32>
    %c7_i32_98 = arith.constant 7 : i32
    %211 = arith.addi %91, %c7_i32_98 : i32
    %212 = arith.index_cast %211 : i32 to index
    %c0_99 = arith.constant 0 : index
    %c0_100 = arith.constant 0 : index
    %213 = vector.load %arg16[%212, %c0_99, %c0_100] : memref<8x16x64xf32, #tpu.memory_space<vmem>>, vector<1x16x64xf32>
    %214 = vector.shape_cast %213 : vector<1x16x64xf32> to vector<16x64xf32>
    %215 = arith.addf %210, %214 : vector<16x64xf32>
    %216 = vector.extract_strided_slice %93 {offsets = [7, 0, 0], sizes = [1, 16, 1], strides = [1, 1, 1]} : vector<8x16x1xf32> to vector<1x16x1xf32>
    %217 = vector.shape_cast %216 : vector<1x16x1xf32> to vector<16x1xf32>
    %218 = vector.broadcast %217 : vector<16x1xf32> to vector<16x64xf32>
    %219 = arith.mulf %215, %218 : vector<16x64xf32>
    %cst_101 = arith.constant dense<0.000000e+00> : vector<64xf32>
    %220 = vector.multi_reduction <add>, %219, %cst_101 [0] : vector<16x64xf32> to vector<64xf32>
    %221 = vector.shape_cast %220 : vector<64xf32> to vector<1x64xf32>
    %222 = tpu.concatenate %109, %125, %141, %157, %173, %189, %205, %221 in 0 : vector<1x64xf32>, vector<1x64xf32>, vector<1x64xf32>, vector<1x64xf32>, vector<1x64xf32>, vector<1x64xf32>, vector<1x64xf32>, vector<1x64xf32> -> vector<8x64xf32>
    %223 = arith.index_cast %91 : i32 to index
    %c0_102 = arith.constant 0 : index
    %224 = vector.load %arg18[%223, %c0_102] : memref<8x64xf32, #tpu.memory_space<vmem>>, vector<8x64xf32>
    tpu.vector_store %arg18[%223, %c0_102], %222 {strides = array<i32>} : memref<8x64xf32, #tpu.memory_space<vmem>>, vector<8x64xf32>,
    %c1_i32_103 = arith.constant 1 : i32
    %c0_104 = arith.constant 0 : index
    %c0_105 = arith.constant 0 : index
    %225 = vector.load %arg19[%c0_104, %c0_105] : memref<16x64xf32, #tpu.memory_space<vmem>>, vector<16x64xf32>
    tpu.vector_store %arg19[%c0_104, %c0_105], %215 {strides = array<i32>} : memref<16x64xf32, #tpu.memory_space<vmem>>, vector<16x64xf32>,
    %c0_106 = arith.constant 0 : index
    %c0_107 = arith.constant 0 : index
    %226 = vector.load %arg18[%c0_106, %c0_107] : memref<8x64xf32, #tpu.memory_space<vmem>>, vector<8x64xf32>
    %c0_108 = arith.constant 0 : index
    %c0_109 = arith.constant 0 : index
    %227 = vector.load %arg10[%c0_108, %c0_109] : memref<1x64xf32, #tpu.memory_space<vmem>>, vector<1x64xf32>
    %228 = vector.broadcast %227 : vector<1x64xf32> to vector<8x64xf32>
    %229 = arith.mulf %228, %53 : vector<8x64xf32>
    %230 = arith.addf %226, %229 : vector<8x64xf32>
    %cst_110 = arith.constant 0.000000e+00 : f32
    %231 = vector.broadcast %cst_110 : f32 to vector<8x64xf32>
    %232 = arith.subf %231, %21 : vector<8x64xf32>
    %233 = math.exp %232 : vector<8x64xf32>
    %cst_111 = arith.constant 1.000000e+00 : f32
    %234 = vector.broadcast %cst_111 : f32 to vector<8x64xf32>
    %235 = arith.addf %234, %233 : vector<8x64xf32>
    %236 = arith.divf %21, %235 : vector<8x64xf32>
    %237 = arith.mulf %230, %236 : vector<8x64xf32>
    %c0_112 = arith.constant 0 : index
    %c0_113 = arith.constant 0 : index
    %238 = vector.load %arg11[%c0_112, %c0_113] : memref<64x32xf32, #tpu.memory_space<vmem>>, vector<64x32xf32>
    %cst_114 = arith.constant dense<0.000000e+00> : vector<8x32xf32>
    %239 = tpu.matmul %237, %238, %cst_114 {dimension_numbers = #tpu.dot_dimension_numbers<[1], [0], [0], [1], [0, 0, 1, 1], [], []>} : vector<8x64xf32>, vector<64x32xf32>, vector<8x32xf32> -> vector<8x32xf32>
    %240 = arith.addf %239, %4 : vector<8x32xf32>
    %c0_115 = arith.constant 0 : index
    %c0_116 = arith.constant 0 : index
    %c0_117 = arith.constant 0 : index
    %241 = vector.load %arg12[%c0_115, %c0_116, %c0_117] : memref<1x8x32xf32, #tpu.memory_space<vmem>>, vector<1x8x32xf32>
    %242 = vector.shape_cast %241 : vector<1x8x32xf32> to vector<8x32xf32>
    %243 = vector.shape_cast %240 : vector<8x32xf32> to vector<1x8x32xf32>
    tpu.vector_store %arg12[%c0_115, %c0_116, %c0_117], %243 {strides = array<i32>} : memref<1x8x32xf32, #tpu.memory_space<vmem>>, vector<1x8x32xf32>,
    return
  }
  func.func @transform_0(%arg0: i32, %arg1: i32) -> (i32, i32, i32) {
    %c0_i32 = arith.constant 0 : i32
    %c0_i32_0 = arith.constant 0 : i32
    return %arg0, %arg1, %c0_i32 : i32, i32, i32
  }
  func.func @transform_1(%arg0: i32, %arg1: i32) -> (i32, i32) {
    %c0_i32 = arith.constant 0 : i32
    %c0_i32_0 = arith.constant 0 : i32
    %c0_i32_1 = arith.constant 0 : i32
    return %c0_i32, %c0_i32_0 : i32, i32
  }
  func.func @transform_2(%arg0: i32, %arg1: i32) -> (i32, i32) {
    %c0_i32 = arith.constant 0 : i32
    %c0_i32_0 = arith.constant 0 : i32
    %c0_i32_1 = arith.constant 0 : i32
    return %c0_i32, %c0_i32_0 : i32, i32
  }
  func.func @transform_3(%arg0: i32, %arg1: i32) -> (i32, i32) {
    %c0_i32 = arith.constant 0 : i32
    %c0_i32_0 = arith.constant 0 : i32
    %c0_i32_1 = arith.constant 0 : i32
    return %c0_i32, %c0_i32_0 : i32, i32
  }
  func.func @transform_4(%arg0: i32, %arg1: i32) -> (i32, i32) {
    %c0_i32 = arith.constant 0 : i32
    %c0_i32_0 = arith.constant 0 : i32
    %c0_i32_1 = arith.constant 0 : i32
    return %c0_i32, %c0_i32_0 : i32, i32
  }
  func.func @transform_5(%arg0: i32, %arg1: i32) -> (i32, i32) {
    %c0_i32 = arith.constant 0 : i32
    %c0_i32_0 = arith.constant 0 : i32
    %c0_i32_1 = arith.constant 0 : i32
    return %c0_i32, %c0_i32_0 : i32, i32
  }
  func.func @transform_6(%arg0: i32, %arg1: i32) -> (i32, i32) {
    %c0_i32 = arith.constant 0 : i32
    %c0_i32_0 = arith.constant 0 : i32
    %c0_i32_1 = arith.constant 0 : i32
    return %c0_i32, %c0_i32_0 : i32, i32
  }
  func.func @transform_7(%arg0: i32, %arg1: i32) -> (i32, i32) {
    %c0_i32 = arith.constant 0 : i32
    %c0_i32_0 = arith.constant 0 : i32
    %c0_i32_1 = arith.constant 0 : i32
    return %c0_i32, %c0_i32_0 : i32, i32
  }
  func.func @transform_8(%arg0: i32, %arg1: i32) -> (i32, i32) {
    %c0_i32 = arith.constant 0 : i32
    %c0_i32_0 = arith.constant 0 : i32
    %c0_i32_1 = arith.constant 0 : i32
    return %c0_i32, %c0_i32_0 : i32, i32
  }
  func.func @transform_9(%arg0: i32, %arg1: i32) -> (i32, i32) {
    %c0_i32 = arith.constant 0 : i32
    %c0_i32_0 = arith.constant 0 : i32
    %c0_i32_1 = arith.constant 0 : i32
    return %c0_i32, %c0_i32_0 : i32, i32
  }
  func.func @transform_10(%arg0: i32, %arg1: i32) -> (i32, i32, i32) {
    %c0_i32 = arith.constant 0 : i32
    %c0_i32_0 = arith.constant 0 : i32
    return %arg0, %arg1, %c0_i32 : i32, i32, i32
  }
}

</mosaic_0001>

<bundles_post_ra>
// kernel: tpu_custom_call.1
= control target key start
LH: loop header
LB: loop body
LE: loop exit
PB: predicated region body
PF: predicated region fallthrough
CT: control target
= control target key end

     0   :  { %s2438_s0 = inlined_call_operand.hbm [shape: f32[2,8,32], index: 0, kind: input, shape index: {}]   ;;  %s2439_s1 = inlined_call_operand.hbm [shape: f32[1,32], index: 1, kind: input, shape index: {}]   ;;  %s2440_s2 = inlined_call_operand.vmem [shape: f32[32,128], index: 2, kind: input, shape index: {}]   ;;  %s2441_s3 = inlined_call_operand.vmem [shape: f32[4,64], index: 3, kind: input, shape index: {}]   ;;  %s2442_s4 = inlined_call_operand.hbm [shape: f32[1,64], index: 4, kind: input, shape index: {}]   ;;  %s2443_s5 = inlined_call_operand.vmem [shape: f32[64,96], index: 5, kind: input, shape index: {}]   ;;  %s2444_s6 = inlined_call_operand.vmem [shape: f32[1,64], index: 6, kind: input, shape index: {}]   ;;  %s2445_s7 = inlined_call_operand.hbm [shape: f32[16,64], index: 7, kind: input, shape index: {}]   ;;  %s2446_s8 = inlined_call_operand.vmem [shape: f32[1,64], index: 8, kind: input, shape index: {}]   ;;  %s2447_s9 = inlined_call_operand.vmem [shape: f32[64,32], index: 9, kind: input, shape index: {}]   ;;  %s2448_s10 = inlined_call_operand.hbm [shape: f32[2,8,32], index: 10, kind: output, shape index: {}]  }
   0x1   :  { %2453 = sst [smem:[#allocation25_spill]] %s2439_s1 }
   0x2   :  { %2454 = sst [smem:[#allocation26_spill]] %s2442_s4 }
   0x3   :  { %2455 = sst [smem:[#allocation27_spill]] %s2445_s7 }
   0x4   :  { %15 = vsyncpa [#allocation10], 0 }
   0x5   :  { %17 = vsyncpa [#allocation10 + $0x1], 0 }
   0x6   :  { %18 = vsyncpa [#allocation13], 0 }
   0x7   :  { %19 = vsyncpa [#allocation16], 0 }
   0x8   :  { %20 = vsyncpa [#allocation11], 0 }
   0x9   :  { %22 = vsyncpa [#allocation11 + $0x1], 0  ;;  %s1945_s13 = smov 0   ;;  %s1947_s14 = smov 0  }
   0xa   :  { %s1949_s15 = smov 0   ;;  %s1951_s16 = smov 0  }
   0xb   :  { %s1953_s17 = smov 0   ;;  %s1955_s18 = smov 0  }
   0xc LB: > { %2456 = sst [smem:[#allocation22_spill]] %s1859_s13  ;;  %s1467_s19 = sadd.s32 4294967295, %s1879_s18   ;;  %s1879_s18 = sphi %s1955_s18, %s28_s18   ;;  %s1875_s17 = sphi %s1953_s17, %s2477_s17   ;;  %s1871_s16 = sphi %s1951_s16, %s2476_s16   ;;  %s1867_s15 = sphi %s1949_s15, %s2475_s15   ;;  %s1863_s14 = sphi %s1947_s14, %s2474_s14   ;;  %s1859_s13 = sphi %s1945_s13, %s2473_s13  }
   0xd   : > { %s1468_s20 = sadd.s32 4294967294, %s1879_s18   ;;  %p62_p0 = scmp.ne.s32.totalorder %s1863_s14, %s1859_s13 }
   0xe   : > { %p1979_p1 = scmp.eq.s32.totalorder %s1467_s19, 0  ;;  %p1983_p2 = scmp.eq.s32.totalorder %s1467_s19, 1 }
   0xf   : > { %p283_p3 = scmp.eq.s32.totalorder %s1468_s20, 1  ;;  %p1469_p5 = scmp.ge.s32.totalorder %s1879_s18, 1 }
  0x10   : > { %p1989_p4 = por %p1979_p1, %p62_p0  ;;  %p290_p7 = scmp.lt.s32.totalorder %s1879_s18, 3 }
  0x11   : > { %p1994_p6 = por %p283_p3, %p62_p0  ;;  %s2462_s1 = sld [smem:[#allocation25_spill]] }
  0x12   : > { %p2002_p8 = pnand %p1469_p5, %p290_p7  ;;  %p1473_p9 = scmp.ge.s32.totalorder %s1879_s18, 2 }
  0x13   : > { %s2460_s24 = scalar_select %p1994_p6, 1, 0 }
  0x14   : > { %p1505_p10 = pneg %p2002_p8  ;;  %s1881_s29 = smov [#allocation12]  }
  0x15   : > { %2461 = sst [smem:[#allocation23_spill]] %s2460_s24  ;;  %s304_s30 = sshll.u32 %s1881_s29, 4  ;;  %s305_s30 = int_to_ptr.vmem [resolvable:$true] %s304_s30 }
  0x16   : > { %s2464_s4 = sld [smem:[#allocation26_spill]]  ;;  %p2014_p11 = pnand %p1505_p10, %p1979_p1 }
  0x17   : > { %s302_s27 = sshll.u32 %s2462_s1, 4  ;;  %s2466_s7 = sld [smem:[#allocation27_spill]]  ;;  %s303_s27 = int_to_ptr.hbm [resolvable:$true] %s302_s27 }
  0x18   : > { %s1882_s1 = smov [#allocation14]   ;;  %s1883_s12 = smov [#allocation15]  }
  0x19   : > { %s322_s11 = sshll.u32 %s1882_s1, 4  ;;  %s1884_s25 = smov 128   ;;  %s323_s11 = int_to_ptr.vmem [resolvable:$true] %s322_s11 }
  0x1a   : > { %1508 = dma.hbm_to_vmem [thread:$0]  (!%p2014_p11), %s303_s27, 16, %s305_s30, [#allocation13]  }
  0x1b   : > { %s1885_s26 = smov 8   ;;  %s49_s1 = sadd.s32 1, %s1867_s15 }
  0x1c   : > { %s320_s19 = sshll.u32 %s2464_s4, 4  ;;  %s339_s4 = sshll.u32 %s1883_s12, 4  ;;  %s321_s19 = int_to_ptr.hbm [resolvable:$true] %s320_s19  ;;  %s340_s4 = int_to_ptr.vmem [resolvable:$true] %s339_s4 }
  0x1d   : > { %s337_s29 = sshll.u32 %s2466_s7, 4  ;;  %s40_s7 = sadd.s32 1, %s1875_s17  ;;  %s338_s29 = int_to_ptr.hbm [resolvable:$true] %s337_s29 }
  0x1e   : > { %1511 = dma.hbm_to_vmem [thread:$0]  (!%p2014_p11), %s321_s19, 16, %s323_s11, [#allocation13]  }
  0x1f   : > { %1514 = dma.hbm_to_vmem [thread:$0]  (!%p2014_p11), %s338_s29, 256, %s340_s4, [#allocation16], %s1884_s25, %s1884_s25, %s1885_s26  }
  0x20   : > { %p56_p12 = scmp.ne.s32.totalorder %s1867_s15, %s1863_s14  ;;  %p42_p13 = scmp.ge.s32.totalorder %s40_s7, 2 }
  0x21   : > { %p57_p0 = scmp.eq.s32.totalorder %s1879_s18, 0  ;;  %p1526_p5 = scmp.lt.s32.totalorder %s1879_s18, 2 }
  0x22   : > { %p2034_p3 = por %p1983_p2, %p56_p12  ;;  %s2479_s7 = smov (%p42_p13, %s40_s7), 0 }
  0x23   : > { %p2041_p7 = por %p57_p0, %p56_p12  ;;  %s359_s4 = sand.u32 1, %s1867_s15  }
  0x24   : > { %s2467_s27 = scalar_select %p2034_p3, 1, 0 }
  0x25   : > { %s44_s19 = ssub.s32 %s1875_s17, %s2479_s7  ;;  %s1474_s20 = sshll.u32 %s359_s4, 3 }
  0x26   : > { %2468 = sst [smem:[#allocation24_spill]] %s2467_s27  ;;  %p47_p10 = scmp.eq.s32.totalorder %s44_s19, 0 }
  0x27   : > { %s1475_s29 = sshll.u32 %s1875_s17, 3  ;;  %s363_s26 = scalar_lea.vmem [#allocation9], %s1474_s20 }
  0x28   : > { %s2050_s22 = scalar_select %p47_p10, %s1867_s15, %s49_s1  }
  0x29   : > { %s368_s25 = scalar_lea.hbm %s2438_s0, %s1475_s29  ;;  %s372_s24 = sshll.u32 %s363_s26, 4  ;;  %s373_s24 = int_to_ptr.vmem [resolvable:$true] %s372_s24 }
  0x2a   : > { %s370_s13 = sshll.u32 %s368_s25, 4  ;;  %p1516_p2 = pnand %p1526_p5, %p2041_p7  ;;  %s371_s13 = int_to_ptr.hbm [resolvable:$true] %s370_s13 }
  0x2b   : > { %s360_s27 = scalar_lea.sflag [#allocation10], %s359_s4  ;;  %381 = sbr.rel (%p2002_p8) target bundleno = 1018 (0x3fa), region = 60 }
  0x2c   : > { %1518 = dma.hbm_to_vmem [thread:$0]  (!%p1516_p2), %s371_s13, 128, %s373_s24, %s360_s27  }
  0x2d   : > { %s2062_s1 = sand.u32 (!%p2002_p8), 1, %s1863_s14  }
  0x2e   : > { %s1477_s19 = sshll.u32 (!%p2002_p8), %s2062_s1, 3  ;;  %s384_s20 = scalar_lea.sflag (!%p2002_p8), [#allocation10], %s2062_s1 }
  0x2f   : > { %s2068_s29 = scalar_lea.vmem (!%p2002_p8), [#allocation9], %s1477_s19 }
  0x30   : > { %1842 = dma.done.wait (%p1989_p4), %s384_s20, 128  }
  0x31   : > { %1844 = vsyncadd (%p1989_p4), %s384_s20, 4294967168 }
  0x32   : > { %1846 = dma.done.wait (%p1979_p1), [#allocation13], 32  }
  0x33   : > { %1848 = vsyncadd (%p1979_p1), [#allocation13], 4294967264 }
  0x34   : > { %1850 = dma.done.wait (%p1979_p1), [#allocation16], 256  }
  0x35   : > { %1852 = vsyncadd (%p1979_p1), [#allocation16], 4294967040  ;;  %v449_v0 = vld [vmem:[%s2068_s29] sm:$0xff]  ;;  %vm451_vm0 = vcmask 261120   ;;  %v1886_v3 = vmov 32.0   ;;  %v480_v11 = vld [vmem:[%s2440_s2] sm:$0xff]  ;;  %v701_v55 = vlaneseq }
  0x36   : > { %v450_v1 = vmul.f32 %v449_v0, %v449_v0  ;;  %1620 = vrcp.f32 %v1886_v3  ;;  %v483_v7 = vld [vmem:[%s2440_s2 + $0x18] sm:$0xff]  ;;  %v482_v8 = vld [vmem:[%s2440_s2 + $0x10] sm:$0xff]  ;;  %v481_v9 = vld [vmem:[%s2440_s2 + $0x8] sm:$0xff]  ;;  %vm444_vm2 = vcmask 523264   ;;  %vm447_vm3 = vcmask 518144   ;;  %s1889_s11 = smov 64  }
  0x37   : > { %499 = vmatpush.msra.mxu0 %v483_v7  ;;  %v1887_v13 = vmov 0.0   ;;  %v1612_v24 = vld [vmem:[#allocation12] ss:$0 sm:$0xff]  ;;  %v562_v30 = vld [vmem:[%s2443_s5 + $0x30] sm:$0xff]  ;;  %v561_v31 = vld [vmem:[%s2443_s5 + $0x28] sm:$0xff]  ;;  %vm512_vm7 = vcmask 523269  }
  0x38   : > { %v452_v2 = vsel %vm451_vm0, %v450_v1, 0.0  ;;  %445 = vst.msk [vmem:[#allocation8] sm:$0xff] %vm444_vm2, %v1887_v13  ;;  %v563_v29 = vld [vmem:[%s2443_s5 + $0x38] sm:$0xff]  ;;  %v560_v32 = vld [vmem:[%s2443_s5 + $0x20] sm:$0xff]  ;;  %v558_v34 = vld [vmem:[%s2443_s5 + $0x10] sm:$0xff]  ;;  %v702_v57 = vshrl.u32 %v701_v55, 7 }
  0x39   : > { %453 = vadd.xlane.f32.xlu0 %v452_v2  ;;  %500 = vmatpush.msra.mxu0 %v482_v8  ;;  %446 = vst.msk [vmem:[#allocation8 + $0x8] sm:$0xff] %vm444_vm2, %v1887_v13  ;;  %v559_v33 = vld [vmem:[%s2443_s5 + $0x18] sm:$0xff]  ;;  %v557_v35 = vld [vmem:[%s2443_s5 + $0x8] sm:$0xff]  ;;  %v556_v36 = vld [vmem:[%s2443_s5] sm:$0xff]  ;;  %vm948_vm12 = vcmask 7168   ;;  %s1486_s23 = sshll.u32 %s1871_s16, 3 }
  0x3a   : > { %448 = vst.msk [vmem:[#allocation3] sm:$0x7] %vm447_vm3, %v1887_v13  ;;  %575 = vmatpush.msra.mxu1 %v563_v29  ;;  %v1613_v38 = vld [vmem:[%s2441_s3 + $0x3] ss:$0 sm:$0xff]  ;;  %v1614_v40 = vld [vmem:[#allocation14] ss:$0 sm:$0xff]  ;;  %s1339_s27 = scalar_lea.hbm %s2448_s10, %s1486_s23 }
  0x3b   : > { %501 = vmatpush.msra.mxu0 %v481_v9  ;;  %v1615_v41 = vld [vmem:[%s2441_s3] ss:$0 sm:$0xff]  ;;  %v1616_v42 = vld [vmem:[%s2441_s3 + $0x1] ss:$0 sm:$0xff]  ;;  %v1617_v47 = vld [vmem:[%s2441_s3 + $0x2] ss:$0 sm:$0xff] }
  0x3c   : > { %v1621_v4 = vpop.eup %1620  ;;  %576 = vmatpush.msra.mxu1 %v562_v30  ;;  %v2143_v58 = vadd.s32 72, %v702_v57  ;;  %v2145_v59 = vadd.s32 64, %v702_v57  ;;  %v1618_v9 = vld [vmem:[%s2444_s6] ss:$0 sm:$0xff]  ;;  %s439_s30 = scalar_lea.vmem [#allocation17], %s1477_s19  ;;  %s1328_s12 = scalar_lea.sflag [#allocation11], %s2062_s1 }
  0x3d   : > { %v456_v5 = vmul.f32 32.0, %v1621_v4  ;;  %502 = vmatpush.msra.mxu0 %v480_v11  ;;  %vm460_vm1 = vweird.f32 %v1621_v4  ;;  %s1341_s4 = sshll.u32 %s439_s30, 4  ;;  %s1809_s19 = scalar_lea.hbm %s2448_s10, 16  ;;  %s1342_s4 = int_to_ptr.vmem [resolvable:$true] %s1341_s4 }
  0x3e   : > { %577 = vmatpush.msra.mxu1 %v561_v31  ;;  %1591 = vset.pattern.permute.xlu2 %v2143_v58  ;;  %v602_v31 = vld [vmem:[#allocation15 + $0x8] sm:$0xff] }
  0x3f   : > { %v457_v6 = vsub.f32 1.0, %v456_v5  ;;  %1589 = vset.pattern.permute.xlu1 %v2143_v58  ;;  %1588 = vset.pattern.permute.xlu0 %v2145_v59 }
  0x40   : > { %578 = vmatpush.msra.mxu1 %v560_v32 }
  0x41   : > { %v458_v10 = vmul.f32 %v1621_v4, %v457_v6  ;;  %v507_v28 = vld [vmem:[#allocation3] sm:$0x7] }
  0x42   : > { %509 = vst.msk [vmem:[#allocation2 + $0x5] sm:$0x7] %vm447_vm3, %v507_v28  ;;  %579 = vmatpush.msra.mxu1 %v559_v33  ;;  %v601_v28 = vld [vmem:[#allocation15] sm:$0xff]  ;;  %vm1247_vm3 = vcmask 1040384  }
  0x43   : > { %v459_v12 = vadd.f32 %v1621_v4, %v458_v10 }
  0x44   : > { %580 = vmatpush.msra.mxu1 %v558_v34 }
  0x45   : > { %v461_v14 = vsel %vm460_vm1, %v1621_v4, %v459_v12 }
  0x46   : > { %581 = vmatpush.msra.mxu1 %v557_v35 }
  0x48   : > { %582 = vmatpush.msra.mxu1 %v556_v36 }
  0xac   : > { %v454_v15 = vpop.xlane.xlu0 %453 }
  0xad   : > { %v462_v16 = vmul.f32 %v461_v14, %v454_v15 }
  0xaf   : > { %v463_v17 = vadd.f32 1e-05, %v462_v16 }
  0xb1   : > { %1622 = vrsqrt.f32 %v463_v17  ;;  %vm470_vm5 = vweird.f32 %v463_v17 }
  0xb7   : > { %v1623_v18 = vpop.eup %1622 }
  0xb8   : > { %v465_v19 = vmul.f32 %v1623_v18, %v463_v17  ;;  %vm471_vm4 = vweird.f32 %v1623_v18  ;;  %v2169_v17 = vadd.s32 88, %v702_v57 }
  0xb9   : > { %vm472_vm6 = vmor %vm470_vm5, %vm471_vm4  ;;  %vm1249_vm4 = vcmask 1041408   ;;  %vm1251_vm5 = vcmask 1042432  }
  0xba   : > { %v466_v20 = vmul.f32 %v1623_v18, %v465_v19 }
  0xbc   : > { %v467_v21 = vmul.f32 0.5, %v466_v20 }
  0xbe   : > { %v468_v22 = vsub.f32 1.5, %v467_v21 }
  0xc0   : > { %v469_v23 = vmul.f32 %v1623_v18, %v468_v22  ;;  %v2183_v22 = vadd.s32 80, %v702_v57 }
  0xc2   : > { %v473_v25 = vsel %vm472_vm6, %v1623_v18, %v469_v23  ;;  %vm1253_vm6 = vcmask 1043456  }
  0xc3   : > { %v474_v26 = vmul.f32 %v473_v25, %v449_v0 }
  0xc5   : > { %v479_v27 = vmul.f32 %v1612_v24, %v474_v26 }
  0xc7   : > { %1482 = vmatmul.msk.f32.vlgmr.msra.gmra.mxu0 %vm451_vm0, %v479_v27 }
 0x144   : > { %v2125_v37 = vpop.f32.mrf.mxu0 }
 0x145   : > { %511 = vst.msk [vmem:[#allocation2 + $0x8] sm:$0xff] %vm444_vm2, %v2125_v37  ;;  %v517_v39 = vmul.f32 %v1613_v38, %v2125_v37 }
 0x146   : > { %513 = vst.msk [vmem:[#allocation3 - $0x5] sm:$0xe0] %vm512_vm7, %v2125_v37  ;;  %vm1255_vm7 = vcmask 1044480  }
 0x147   : > { %v521_v45 = vadd.f32 %v1614_v40, %v517_v39 }
 0x14c   : > { %v522_v43 = vld [vmem:[#allocation2 + $0x5] sm:$0xff] }
 0x14d   : > { %v527_v44 = vld [vmem:[#allocation2 + $0x6] sm:$0xff]  ;;  %v525_v46 = vmul.f32 %v1615_v41, %v522_v43 }
 0x14e   : > { %v532_v48 = vld [vmem:[#allocation2 + $0x7] sm:$0xff]  ;;  %v530_v50 = vmul.f32 %v1616_v42, %v527_v44 }
 0x14f   : > { %v526_v49 = vadd.f32 %v525_v46, %v521_v45  ;;  %v535_v52 = vmul.f32 %v1617_v47, %v532_v48 }
 0x151   : > { %v531_v51 = vadd.f32 %v530_v50, %v526_v49 }
 0x153   : > { %v536_v53 = vadd.f32 %v535_v52, %v531_v51 }
 0x155   : > { %v537_v54 = vsub.f32 0.0, %v536_v53 }
 0x157   : > { %v538_v56 = vmul.f32 1.442695, %v537_v54 }
 0x159   : > { %1624 = vpow2.f32 %v538_v56 }
 0x15f   : > { %v1625_v60 = vpop.eup %1624 }
 0x160   : > { %v540_v61 = vadd.f32 1.0, %v1625_v60 }
 0x162   : > { %1626 = vrcp.f32 %v540_v61  ;;  %v552_v1 = vand.u32 2147483648, %v540_v61  ;;  %v550_v3 = vand.u32 2147483647, %v540_v61  ;;  %vm546_vm9 = vweird.f32 %v540_v61 }
 0x164   : > { %v553_v5 = vor.u32 1.1754944e-38, %v552_v1  ;;  %vm551_vm11 = vcmp.eq.f32.partialorder %v550_v3, 8.507059e+37 }
 0x168   : > { %v1627_v62 = vpop.eup %1626 }
 0x169   : > { %v542_v63 = vmul.f32 %v1627_v62, %v540_v61  ;;  %vm547_vm8 = vweird.f32 %v1627_v62 }
 0x16a   : > { %vm548_vm10 = vmor %vm546_vm9, %vm547_vm8  ;;  %vm1257_vm8 = vcmask 1045504   ;;  %vm1259_vm9 = vcmask 1046528  }
 0x16b   : > { %v543_v0 = vsub.f32 1.0, %v542_v63 }
 0x16d   : > { %v544_v2 = vmul.f32 %v1627_v62, %v543_v0 }
 0x16f   : > { %v545_v4 = vadd.f32 %v1627_v62, %v544_v2 }
 0x171   : > { %v549_v6 = vsel %vm548_vm10, %v1627_v62, %v545_v4 }
 0x172   : > { %v554_v7 = vsel %vm551_vm11, %v553_v5, %v549_v6 }
 0x173   : > { %v2150_v8 = vmul.f32 %v554_v7, %v536_v53 }
 0x175   : > { %1483 = vmatmul.msk.f32.vlgmr.msra.gmra.mxu1 %vm444_vm2, %v2150_v8 }
 0x1f2   : > { %v2157_v10 = vpop.f32.mrf.mxu1 }
 0x1f3   : > { %v591_v11 = vadd.f32 %v1618_v9, %v2157_v10  ;;  %v2161_v12 = vperm.slane %v2157_v10, 1  ;;  %v2164_v13 = vperm.slane %v2157_v10, 0  ;;  %v2175_v20 = vperm.slane %v2157_v10, 2 }
 0x1f4   : > { %v2178_v21 = vperm.slane %v2157_v10, 3  ;;  %v2197_v36 = vperm.slane %v2157_v10, 6 }
 0x1f5   : > { %v593_v14 = vand.u32 2147483647, %v591_v11  ;;  %724 = vperm.xlu2 %1591, %v2161_v12   ;;  %711 = vperm.xlu1 %1589, %v2164_v13   ;;  %v592_v24 = vmax.f32 %v591_v11, 0.0 }
 0x1f6   : > { %705 = vperm.xlu0 %1588, %v2164_v13  }
 0x1f7   : > { %v594_v15 = vsub.f32 0.0, %v593_v14 }
 0x1f9   : > { %v595_v16 = vmul.f32 1.442695, %v594_v15 }
 0x1fb   : > { %1628 = vpow2.f32 %v595_v16 }
 0x1fd   : > { %1592 = vset.pattern.permute.xlu2 %v2145_v59  ;;  %1590 = vset.pattern.permute.xlu1 %v2145_v59 }
 0x1fe   : > { %1596 = vset.pattern.permute.xlu0 %v2169_v17 }
 0x201   : > { %v1629_v18 = vpop.eup %1628 }
 0x202   : > { %v597_v19 = vadd.f32 1.0, %v1629_v18 }
 0x204   : > { %1630 = vlog2.f32 %v597_v19 }
 0x205   : > { %731 = vperm.xlu2 %1592, %v2175_v20   ;;  %718 = vperm.xlu1 %1590, %v2161_v12  }
 0x206   : > { %898 = vperm.xlu0 %1596, %v2178_v21  }
 0x20a   : > { %v1631_v23 = vpop.eup %1630 }
 0x20b   : > { %v599_v25 = vmul.f32 0.6931472, %v1631_v23 }
 0x20d   : > { %v2185_v26 = vadd.f32 %v599_v25, %v592_v24  ;;  %1594 = vset.pattern.permute.xlu2 %v2183_v22  ;;  %1593 = vset.pattern.permute.xlu1 %v2143_v58 }
 0x20e   : > { %1599 = vset.pattern.permute.xlu0 %v2183_v22 }
 0x20f   : > { %v611_v27 = vperm.slane %v2185_v26, 0  ;;  %v604_v29 = vrot.slane %v2185_v26, 1  ;;  %v605_v30 = vrot.slane %v2185_v26, 2  ;;  %v606_v32 = vrot.slane %v2185_v26, 3 }
 0x210   : > { %v607_v33 = vrot.slane %v2185_v26, 4  ;;  %v608_v34 = vrot.slane %v2185_v26, 5  ;;  %v609_v38 = vrot.slane %v2185_v26, 6  ;;  %v610_v46 = vrot.slane %v2185_v26, 7 }
 0x211   : > { %v627_v35 = vmul.f32 %v611_v27, %v601_v28  ;;  %v612_v40 = vperm.slane %v604_v29, 0  ;;  %v628_v41 = vmul.f32 %v611_v27, %v602_v31  ;;  %v613_v42 = vperm.slane %v605_v30, 0 }
 0x212   : > { %v614_v43 = vperm.slane %v606_v32, 0  ;;  %v615_v44 = vperm.slane %v607_v33, 0  ;;  %v616_v45 = vperm.slane %v608_v34, 0  ;;  %v617_v2 = vperm.slane %v609_v38, 0 }
 0x213   : > { %v643_v39 = vmul.f32 1.442695, %v627_v35  ;;  %v630_v47 = vmul.f32 %v612_v40, %v602_v31  ;;  %v645_v48 = vmul.f32 1.442695, %v628_v41  ;;  %v632_v49 = vmul.f32 %v613_v42, %v602_v31 }
 0x214   : > { %v629_v50 = vmul.f32 %v612_v40, %v601_v28  ;;  %v631_v51 = vmul.f32 %v613_v42, %v601_v28  ;;  %v633_v52 = vmul.f32 %v614_v43, %v601_v28  ;;  %v635_v53 = vmul.f32 %v615_v44, %v601_v28 }
 0x215   : > { %856 = vperm.xlu2 %1594, %v2164_v13   ;;  %737 = vperm.xlu1 %1593, %v2175_v20   ;;  %1632 = vpow2.f32 %v643_v39  ;;  %v649_v54 = vmul.f32 1.442695, %v630_v47  ;;  %v653_v55 = vmul.f32 1.442695, %v632_v49  ;;  %v637_v56 = vmul.f32 %v616_v45, %v601_v28 }
 0x216   : > { %928 = vperm.xlu0 %1599, %v2197_v36   ;;  %1634 = vpow2.f32 %v645_v48  ;;  %v647_v57 = vmul.f32 1.442695, %v629_v50  ;;  %v651_v60 = vmul.f32 1.442695, %v631_v51  ;;  %v634_v61 = vmul.f32 %v614_v43, %v602_v31 }
 0x217   : > { %1636 = vpow2.f32 %v649_v54  ;;  %v655_v62 = vmul.f32 1.442695, %v633_v52  ;;  %v636_v63 = vmul.f32 %v615_v44, %v602_v31  ;;  %v659_v0 = vmul.f32 1.442695, %v635_v53 }
 0x218   : > { %1638 = vpow2.f32 %v653_v55  ;;  %v638_v1 = vmul.f32 %v616_v45, %v602_v31  ;;  %v663_v4 = vmul.f32 1.442695, %v637_v56  ;;  %v618_v5 = vperm.slane %v610_v46, 0 }
 0x219   : > { %1640 = vpow2.f32 %v647_v57  ;;  %v657_v6 = vmul.f32 1.442695, %v634_v61  ;;  %v639_v7 = vmul.f32 %v617_v2, %v601_v28  ;;  %v661_v11 = vmul.f32 1.442695, %v636_v63 }
 0x21a   : > { %1642 = vpow2.f32 %v651_v60  ;;  %v641_v14 = vmul.f32 %v618_v5, %v601_v28  ;;  %v640_v15 = vmul.f32 %v617_v2, %v602_v31  ;;  %v665_v16 = vmul.f32 1.442695, %v638_v1 }
 0x21b   : > { %v1633_v3 = vpop.eup %1632  ;;  %1644 = vpow2.f32 %v655_v62  ;;  %v642_v18 = vmul.f32 %v618_v5, %v602_v31  ;;  %v667_v23 = vmul.f32 1.442695, %v639_v7  ;;  %v752_v42 = vperm.slane %v2157_v10, 4 }
 0x21c   : > { %675 = vst.msk [vmem:[#allocation4] sm:$0xff] %vm444_vm2, %v1633_v3  ;;  %v1635_v9 = vpop.eup %1634  ;;  %1646 = vpow2.f32 %v659_v0  ;;  %v671_v25 = vmul.f32 1.442695, %v641_v14  ;;  %v669_v29 = vmul.f32 1.442695, %v640_v15  ;;  %v2237_v43 = vmul.f32 %v2185_v26, %v2150_v8 }
 0x21d   : > { %868 = vperm.xlu2 %1594, %v2161_v12   ;;  %1595 = vset.pattern.permute.xlu1 %v2169_v17  ;;  %676 = vst.msk [vmem:[#allocation4 + $0x8] sm:$0xff] %vm444_vm2, %v1635_v9  ;;  %v1637_v19 = vpop.eup %1636  ;;  %1648 = vpow2.f32 %v663_v4  ;;  %v673_v30 = vmul.f32 1.442695, %v642_v18  ;;  %v791_v47 = vperm.slane %v2157_v10, 7  ;;  %v1888_v53 = vmov 0  }
 0x21e   : > { %1603 = vset.pattern.permute.xlu0 %v2143_v58  ;;  %v1639_v24 = vpop.eup %1638  ;;  %678 = vst.msk [vmem:[#allocation4 + $0x18] sm:$0xff] %vm444_vm2, %v1637_v19  ;;  %1650 = vpow2.f32 %v657_v6  ;;  %v693_v44 = vrot.slane %v2237_v43, 1  ;;  %v694_v48 = vrot.slane %v2237_v43, 2  ;;  %v804_v50 = vperm.slane %v2237_v43, 0 }
 0x21f   : > { %v1641_v27 = vpop.eup %1640  ;;  %680 = vst.msk [vmem:[#allocation4 + $0x28] sm:$0xff] %vm444_vm2, %v1639_v24  ;;  %1652 = vpow2.f32 %v661_v11  ;;  %v695_v1 = vrot.slane %v2237_v43, 3  ;;  %v698_v11 = vrot.slane %v2237_v43, 6 }
 0x220   : > { %v1643_v28 = vpop.eup %1642  ;;  %677 = vst.msk [vmem:[#allocation4 + $0x10] sm:$0xff] %vm444_vm2, %v1641_v27  ;;  %1654 = vpow2.f32 %v665_v16  ;;  %v806_v26 = vperm.slane %v694_v48, 0 }
 0x221   : > { %v1645_v32 = vpop.eup %1644  ;;  %679 = vst.msk [vmem:[#allocation4 + $0x20] sm:$0xff] %vm444_vm2, %v1643_v28  ;;  %1656 = vpow2.f32 %v667_v23  ;;  %v807_v3 = vperm.slane %v695_v1, 0  ;;  %v2272_v16 = vperm.slane %v698_v11, 0 }
 0x222   : > { %v1647_v31 = vpop.eup %1646  ;;  %681 = vst.msk [vmem:[#allocation4 + $0x30] sm:$0xff] %vm444_vm2, %v1645_v32  ;;  %1658 = vpow2.f32 %v671_v25  ;;  %v1271_v25 = vsub.f32 0.0, %v2125_v37 }
 0x223   : > { %v1649_v33 = vpop.eup %1648  ;;  %683 = vst.msk [vmem:[#allocation4 + $0x40] sm:$0xff] %vm444_vm2, %v1647_v31  ;;  %1660 = vpow2.f32 %v669_v29 }
 0x224   : > { %v1651_v34 = vpop.eup %1650  ;;  %685 = vst.msk [vmem:[#allocation4 + $0x50] sm:$0xff] %vm444_vm2, %v1649_v33  ;;  %1662 = vpow2.f32 %v673_v30  ;;  %v1272_v29 = vmul.f32 1.442695, %v1271_v25 }
 0x225   : > { %880 = vperm.xlu2 %1594, %v2175_v20   ;;  %862 = vperm.xlu1 %1595, %v2164_v13   ;;  %v1653_v35 = vpop.eup %1652  ;;  %682 = vst.msk [vmem:[#allocation4 + $0x38] sm:$0xff] %vm444_vm2, %v1651_v34 }
 0x226   : > { %750 = vperm.xlu0 %1603, %v2178_v21   ;;  %v1655_v13 = vpop.eup %1654  ;;  %684 = vst.msk [vmem:[#allocation4 + $0x48] sm:$0xff] %vm444_vm2, %v1653_v35  ;;  %1664 = vpow2.f32 %v1272_v29 }
 0x227   : > { %v1657_v38 = vpop.eup %1656  ;;  %686 = vst.msk [vmem:[#allocation4 + $0x58] sm:$0xff] %vm444_vm2, %v1655_v13 }
 0x228   : > { %v1659_v39 = vpop.eup %1658  ;;  %687 = vst.msk [vmem:[#allocation4 + $0x60] sm:$0xff] %vm444_vm2, %v1657_v38  ;;  %v1052_v11 = vld [vmem:[#allocation4 + $0x20] sm:$0xff] }
 0x229   : > { %v1661_v40 = vpop.eup %1660  ;;  %689 = vst.msk [vmem:[#allocation4 + $0x70] sm:$0xff] %vm444_vm2, %v1659_v39 }
 0x22a   : > { %v1663_v41 = vpop.eup %1662  ;;  %688 = vst.msk [vmem:[#allocation4 + $0x68] sm:$0xff] %vm444_vm2, %v1661_v40 }
 0x22b   : > { %690 = vst.msk [vmem:[#allocation4 + $0x78] sm:$0xff] %vm444_vm2, %v1663_v41 }
 0x22c   : > { %v1665_v33 = vpop.eup %1664 }
 0x22d   : > { %892 = vperm.xlu2 %1594, %v2178_v21   ;;  %874 = vperm.xlu1 %1595, %v2161_v12   ;;  %v765_v12 = vperm.slane %v2157_v10, 5  ;;  %v1274_v35 = vadd.f32 1.0, %v1665_v33 }
 0x22e   : > { %1606 = vset.pattern.permute.xlu0 %v2145_v59 }
 0x22f   : > { %1666 = vrcp.f32 %v1274_v35  ;;  %vm1280_vm14 = vweird.f32 %v1274_v35 }
 0x235   : > { %1598 = vset.pattern.permute.xlu2 %v2169_v17  ;;  %886 = vperm.xlu1 %1595, %v2175_v20   ;;  %v805_v20 = vperm.slane %v693_v44, 0  ;;  %v1667_v41 = vpop.eup %1666 }
 0x236   : > { %783 = vperm.xlu0 %1606, %v2197_v36   ;;  %v1276_v44 = vmul.f32 %v1667_v41, %v1274_v35  ;;  %vm1281_vm13 = vweird.f32 %v1667_v41 }
 0x237   : > { %vm1282_vm15 = vmor %vm1280_vm14, %vm1281_vm13 }
 0x23d   : > { %910 = vperm.xlu2 %1598, %v752_v42   ;;  %1597 = vset.pattern.permute.xlu1 %v2183_v22 }
 0x23e   : > { %1610 = vset.pattern.permute.xlu0 %v1888_v53 }
 0x245   : > { %922 = vperm.xlu2 %1598, %v765_v12   ;;  %904 = vperm.xlu1 %1597, %v752_v42  }
 0x24d   : > { %1601 = vset.pattern.permute.xlu2 %v2183_v22  ;;  %916 = vperm.xlu1 %1597, %v765_v12  }
 0x24f   : > { %v725_v45 = vpop.permute.xlu2 %724 }
 0x250   : > { %v823_v46 = vmul.f32 %v805_v20, %v725_v45  ;;  %v1277_v45 = vsub.f32 1.0, %v1276_v44 }
 0x252   : > { %839 = vst.msk [vmem:[#allocation5 + $0x18] sm:$0xff] %vm444_vm2, %v823_v46 }
 0x255   : > { %940 = vperm.xlu2 %1601, %v791_v47   ;;  %1600 = vset.pattern.permute.xlu1 %v2169_v17 }
 0x259   : > { %v1025_v33 = vld [vmem:[#allocation5 + $0x18] sm:$0xff] }
 0x25d   : > { %1602 = vset.pattern.permute.xlu2 %v2145_v59  ;;  %934 = vperm.xlu1 %1600, %v2197_v36  }
 0x25f   : > { %v732_v49 = vpop.permute.xlu2 %731 }
 0x260   : > { %v824_v22 = vmul.f32 %v806_v26, %v732_v49 }
 0x262   : > { %840 = vst.msk [vmem:[#allocation5 + $0x20] sm:$0xff] %vm444_vm2, %v824_v22  ;;  %v1278_v22 = vmul.f32 %v1667_v41, %v1277_v45 }
 0x265   : > { %744 = vperm.xlu2 %1602, %v2178_v21   ;;  %946 = vperm.xlu1 %1600, %v791_v47  }
 0x267   : > { %v712_v10 = vpop.permute.xlu1 %711 }
 0x268   : > { %v821_v51 = vmul.f32 %v804_v50, %v712_v10  ;;  %v706_v52 = vpop.permute.xlu0 %705  ;;  %v1279_v10 = vadd.f32 %v1667_v41, %v1278_v22 }
 0x269   : > { %v820_v17 = vmul.f32 %v804_v50, %v706_v52  ;;  %v697_v50 = vrot.slane %v2237_v43, 5  ;;  %v965_v52 = vld [vmem:[#allocation8] sm:$0xff] }
 0x26a   : > { %837 = vst.msk [vmem:[#allocation5 + $0x8] sm:$0xff] %vm444_vm2, %v821_v51  ;;  %v1286_v51 = vand.u32 2147483648, %v1274_v35 }
 0x26b   : > { %836 = vst.msk [vmem:[#allocation5] sm:$0xff] %vm444_vm2, %v820_v17  ;;  %v986_v17 = vld [vmem:[#allocation4] sm:$0xff] }
 0x26d   : > { %1605 = vset.pattern.permute.xlu2 %v2143_v58  ;;  %1604 = vset.pattern.permute.xlu1 %v2145_v59 }
 0x26f   : > { %v857_v54 = vpop.permute.xlu2 %856 }
 0x270   : > { %949 = vst.msk [vmem:[#allocation6] sm:$0xff] %vm948_vm12, %v857_v54  ;;  %v1284_v54 = vand.u32 2147483647, %v1274_v35 }
 0x272   : > { %vm1285_vm1 = vcmp.eq.f32.partialorder %v1284_v54, 8.507059e+37 }
 0x275   : > { %763 = vperm.xlu2 %1605, %v752_v42   ;;  %757 = vperm.xlu1 %1604, %v752_v42  }
 0x277   : > { %v869_v21 = vpop.permute.xlu2 %868  ;;  %v719_v55 = vpop.permute.xlu1 %718 }
 0x278   : > { %951 = vst.msk [vmem:[#allocation6 + $0x10] sm:$0xff] %vm948_vm12, %v869_v21  ;;  %v822_v56 = vmul.f32 %v805_v20, %v719_v55  ;;  %v899_v57 = vpop.permute.xlu0 %898  ;;  %v696_v20 = vrot.slane %v2237_v43, 4 }
 0x279   : > { %956 = vst.msk [vmem:[#allocation6 + $0x38] sm:$0xff] %vm948_vm12, %v899_v57  ;;  %v991_v57 = vld [vmem:[#allocation5] sm:$0xff] }
 0x27a   : > { %838 = vst.msk [vmem:[#allocation5 + $0x10] sm:$0xff] %vm444_vm2, %v822_v56  ;;  %v808_v46 = vperm.slane %v696_v20, 0 }
 0x27d   : > { %776 = vperm.xlu2 %1605, %v765_v12   ;;  %770 = vperm.xlu1 %1604, %v765_v12  }
 0x27f   : > { %v881_v60 = vpop.permute.xlu2 %880  ;;  %v971_v6 = vld [vmem:[#allocation6 + $0x10] sm:$0xff] }
 0x280   : > { %953 = vst.msk [vmem:[#allocation6 + $0x20] sm:$0xff] %vm948_vm12, %v881_v60  ;;  %v976_v27 = vld [vmem:[#allocation6 + $0x38] sm:$0xff] }
 0x285   : > { %1608 = vset.pattern.permute.xlu2 %v2145_v59  ;;  %1607 = vset.pattern.permute.xlu1 %v2143_v58  ;;  %v969_v59 = vld [vmem:[#allocation6] sm:$0xff] }
 0x287   : > { %v893_v61 = vpop.permute.xlu2 %892  ;;  %v738_v62 = vpop.permute.xlu1 %737  ;;  %v973_v14 = vld [vmem:[#allocation6 + $0x20] sm:$0xff] }
 0x288   : > { %955 = vst.msk [vmem:[#allocation6 + $0x30] sm:$0xff] %vm948_vm12, %v893_v61  ;;  %v825_v63 = vmul.f32 %v806_v26, %v738_v62  ;;  %v929_v0 = vpop.permute.xlu0 %928  ;;  %v1283_v61 = vsel %vm1282_vm15, %v1667_v41, %v1279_v10  ;;  %v988_v62 = vmul.f32 %v986_v17, %v965_v52  ;;  %v1118_v41 = vld [vmem:[#allocation4 + $0x40] sm:$0xff]  ;;  %v1119_v17 = vld [vmem:[#allocation4 + $0x48] sm:$0xff] }
 0x289   : > { %961 = vst.msk [vmem:[#allocation6 + $0x60] sm:$0xff] %vm948_vm12, %v929_v0 }
 0x28a   : > { %841 = vst.msk [vmem:[#allocation5 + $0x28] sm:$0xff] %vm444_vm2, %v825_v63  ;;  %v1287_v63 = vor.u32 1.1754944e-38, %v1286_v51  ;;  %v2288_v0 = vadd.f32 %v991_v57, %v988_v62  ;;  %v1184_v51 = vld [vmem:[#allocation4 + $0x60] sm:$0xff]  ;;  %v1217_v57 = vld [vmem:[#allocation4 + $0x70] sm:$0xff] }
 0x28c   : > { %v1288_v1 = vsel %vm1285_vm1, %v1287_v63, %v1283_v61 }
 0x28d   : > { %796 = vperm.xlu2 %1608, %v791_v47   ;;  %789 = vperm.xlu1 %1607, %v2197_v36  }
 0x28f   : > { %v975_v23 = vld [vmem:[#allocation6 + $0x30] sm:$0xff] }
 0x290   : > { %v981_v34 = vld [vmem:[#allocation6 + $0x60] sm:$0xff] }
 0x295   : > { %1609 = vset.pattern.permute.xlu2 %v1888_v53  ;;  %802 = vperm.xlu1 %1607, %v791_v47  }
 0x296   : > { %997 = vperm.xlu2 %1609, %v969_v59   ;;  %v1019_v59 = vld [vmem:[#allocation4 + $0x10] sm:$0xff] }
 0x297   : > { %v911_v58 = vpop.permute.xlu2 %910  ;;  %v863_v2 = vpop.permute.xlu1 %862 }
 0x298   : > { %958 = vst.msk [vmem:[#allocation6 + $0x48] sm:$0xff] %vm948_vm12, %v911_v58  ;;  %v751_v4 = vpop.permute.xlu0 %750  ;;  %v1024_v58 = vld [vmem:[#allocation5 + $0x10] sm:$0xff] }
 0x299   : > { %950 = vst.msk [vmem:[#allocation6 + $0x8] sm:$0xff] %vm948_vm12, %v863_v2  ;;  %v827_v5 = vmul.f32 %v807_v3, %v751_v4  ;;  %v1289_v2 = vmul.f32 %v1288_v1, %v2125_v37 }
 0x29b   : > { %843 = vst.msk [vmem:[#allocation5 + $0x38] sm:$0xff] %vm444_vm2, %v827_v5 }
 0x29d   : > { %1611 = vset.pattern.permute.xlu1 %v1888_v53  ;;  %v809_v53 = vperm.slane %v697_v50, 0 }
 0x29e   : > { %1030 = vperm.xlu1 %1611, %v971_v6   ;;  %v966_v6 = vld [vmem:[#allocation8 + $0x8] sm:$0xff] }
 0x29f   : > { %v923_v36 = vpop.permute.xlu2 %922  ;;  %v875_v7 = vpop.permute.xlu1 %874  ;;  %v978_v32 = vld [vmem:[#allocation6 + $0x48] sm:$0xff] }
 0x2a0   : > { %960 = vst.msk [vmem:[#allocation6 + $0x58] sm:$0xff] %vm948_vm12, %v923_v36  ;;  %v970_v9 = vld [vmem:[#allocation6 + $0x8] sm:$0xff] }
 0x2a1   : > { %952 = vst.msk [vmem:[#allocation6 + $0x18] sm:$0xff] %vm948_vm12, %v875_v7  ;;  %1002 = vperm.xlu0 %1610, %v970_v9   ;;  %v987_v36 = vld [vmem:[#allocation4 + $0x8] sm:$0xff]  ;;  %v699_v7 = vrot.slane %v2237_v43, 7 }
 0x2a2   : > { %v992_v9 = vld [vmem:[#allocation5 + $0x8] sm:$0xff] }
 0x2a6   : > { %1063 = vperm.xlu1 %1611, %v973_v14   ;;  %v989_v14 = vmul.f32 %v987_v36, %v966_v6  ;;  %v1185_v36 = vld [vmem:[#allocation4 + $0x68] sm:$0xff] }
 0x2a7   : > { %v887_v15 = vpop.permute.xlu1 %886  ;;  %v980_v42 = vld [vmem:[#allocation6 + $0x58] sm:$0xff] }
 0x2a8   : > { %954 = vst.msk [vmem:[#allocation6 + $0x28] sm:$0xff] %vm948_vm12, %v887_v15  ;;  %v784_v18 = vpop.permute.xlu0 %783  ;;  %v972_v19 = vld [vmem:[#allocation6 + $0x18] sm:$0xff] }
 0x2a9   : > { %v832_v24 = vmul.f32 %v2272_v16, %v784_v18  ;;  %1035 = vperm.xlu2 %1609, %v972_v19   ;;  %1096 = vperm.xlu0 %1610, %v975_v23   ;;  %v811_v18 = vperm.slane %v699_v7, 0  ;;  %v2296_v19 = vadd.f32 %v992_v9, %v989_v14  ;;  %v1218_v14 = vld [vmem:[#allocation4 + $0x78] sm:$0xff] }
 0x2ab   : > { %848 = vst.msk [vmem:[#allocation5 + $0x60] sm:$0xff] %vm444_vm2, %v832_v24  ;;  %v1057_v24 = vld [vmem:[#allocation5 + $0x20] sm:$0xff] }
 0x2ae   : > { %1101 = vperm.xlu1 %1611, %v976_v27  }
 0x2af   : > { %v941_v28 = vpop.permute.xlu2 %940  ;;  %v974_v30 = vld [vmem:[#allocation6 + $0x28] sm:$0xff] }
 0x2b0   : > { %963 = vst.msk [vmem:[#allocation6 + $0x70] sm:$0xff] %vm948_vm12, %v941_v28  ;;  %v1020_v28 = vld [vmem:[#allocation4 + $0x18] sm:$0xff] }
 0x2b1   : > { %1068 = vperm.xlu2 %1609, %v974_v30   ;;  %1134 = vperm.xlu0 %1610, %v978_v32   ;;  %v1022_v43 = vmul.f32 %v1020_v28, %v2296_v19  ;;  %v1085_v30 = vld [vmem:[#allocation4 + $0x30] sm:$0xff] }
 0x2b2   : > { %v1189_v54 = vld [vmem:[#allocation5 + $0x60] sm:$0xff] }
 0x2b7   : > { %v905_v31 = vpop.permute.xlu1 %904  ;;  %v983_v26 = vld [vmem:[#allocation6 + $0x70] sm:$0xff] }
 0x2b8   : > { %957 = vst.msk [vmem:[#allocation6 + $0x40] sm:$0xff] %vm948_vm12, %v905_v31 }
 0x2b9   : > { %1195 = vperm.xlu0 %1610, %v981_v34   ;;  %v2304_v34 = vadd.f32 %v1025_v33, %v1022_v43 }
 0x2bf   : > { %v745_v13 = vpop.permute.xlu2 %744  ;;  %v917_v38 = vpop.permute.xlu1 %916  ;;  %v977_v39 = vld [vmem:[#allocation6 + $0x40] sm:$0xff] }
 0x2c0   : > { %v826_v40 = vmul.f32 %v807_v3, %v745_v13  ;;  %959 = vst.msk [vmem:[#allocation6 + $0x50] sm:$0xff] %vm948_vm12, %v917_v38  ;;  %1129 = vperm.xlu2 %1609, %v977_v39   ;;  %v1021_v3 = vmul.f32 %v1019_v59, %v2288_v0  ;;  %v1053_v39 = vld [vmem:[#allocation4 + $0x28] sm:$0xff]  ;;  %v1152_v59 = vld [vmem:[#allocation4 + $0x58] sm:$0xff] }
 0x2c2   : > { %842 = vst.msk [vmem:[#allocation5 + $0x30] sm:$0xff] %vm444_vm2, %v826_v40  ;;  %v2292_v5 = vadd.f32 %v1024_v58, %v1021_v3  ;;  %v1058_v40 = vld [vmem:[#allocation5 + $0x28] sm:$0xff] }
 0x2c4   : > { %v1054_v15 = vmul.f32 %v1052_v11, %v2292_v5 }
 0x2c6   : > { %v2298_v29 = vadd.f32 %v1057_v24, %v1054_v15 }
 0x2c7   : > { %v979_v12 = vld [vmem:[#allocation6 + $0x50] sm:$0xff] }
 0x2c8   : > { %1167 = vperm.xlu2 %1609, %v980_v42   ;;  %1162 = vperm.xlu1 %1611, %v979_v12   ;;  %v1087_v31 = vmul.f32 %v1085_v30, %v2298_v29  ;;  %v1055_v42 = vmul.f32 %v1053_v39, %v2304_v34 }
 0x2c9   : > { %v1090_v32 = vld [vmem:[#allocation5 + $0x30] sm:$0xff] }
 0x2ca   : > { %v2306_v35 = vadd.f32 %v1090_v32, %v1087_v31  ;;  %v1060_v20 = vadd.f32 %v1058_v40, %v1055_v42 }
 0x2cc   : > { %v1120_v12 = vmul.f32 %v1118_v41, %v2306_v35 }
 0x2cf   : > { %v764_v47 = vpop.permute.xlu2 %763  ;;  %v935_v48 = vpop.permute.xlu1 %934 }
 0x2d0   : > { %v829_v49 = vmul.f32 %v808_v46, %v764_v47  ;;  %962 = vst.msk [vmem:[#allocation6 + $0x68] sm:$0xff] %vm948_vm12, %v935_v48  ;;  %1228 = vperm.xlu2 %1609, %v983_v26   ;;  %v1086_v47 = vld [vmem:[#allocation4 + $0x38] sm:$0xff] }
 0x2d1   : > { %v1091_v48 = vld [vmem:[#allocation5 + $0x38] sm:$0xff] }
 0x2d2   : > { %845 = vst.msk [vmem:[#allocation5 + $0x48] sm:$0xff] %vm444_vm2, %v829_v49  ;;  %v1088_v49 = vmul.f32 %v1086_v47, %v1060_v20 }
 0x2d4   : > { %v1093_v10 = vadd.f32 %v1091_v48, %v1088_v49 }
 0x2d7   : > { %v777_v21 = vpop.permute.xlu2 %776  ;;  %v947_v55 = vpop.permute.xlu1 %946  ;;  %v982_v56 = vld [vmem:[#allocation6 + $0x68] sm:$0xff] }
 0x2d8   : > { %v831_v60 = vmul.f32 %v809_v53, %v777_v21  ;;  %964 = vst.msk [vmem:[#allocation6 + $0x78] sm:$0xff] %vm948_vm12, %v947_v55  ;;  %1200 = vperm.xlu1 %1611, %v982_v56   ;;  %v1121_v21 = vmul.f32 %v1119_v17, %v1093_v10 }
 0x2da   : > { %847 = vst.msk [vmem:[#allocation5 + $0x58] sm:$0xff] %vm444_vm2, %v831_v60 }
 0x2df   : > { %v984_v4 = vld [vmem:[#allocation6 + $0x78] sm:$0xff] }
 0x2e0   : > { %1291 = vrot.lane.b32.xlu1 %v1289_v2, %s1889_s11  ;;  %1233 = vperm.xlu0 %1610, %v984_v4   ;;  %s1343_s11 = sshll.u32 %s1339_s27, 4  ;;  %s1344_s11 = int_to_ptr.hbm [resolvable:$true] %s1343_s11 }
 0x2e1   : > { %v1157_v58 = vld [vmem:[#allocation5 + $0x58] sm:$0xff]  ;;  %s1803_s25 = sshra.s32 %s1344_s11, 4  ;;  %s1804_s25 = int_to_ptr.hbm [resolvable:$true] %s1803_s25 }
 0x2e2   : > { %s1805_s16 = scalar_lea.hbm %s1804_s25, 8  ;;  %p1810_p11 = scmp.lt.s32.totalorder %s1804_s25, %s2448_s10 }
 0x2e3   : > { %p1806_p1 = scmp.ne.s32.totalorder %s1804_s25, %s1805_s16  ;;  %p1811_p12 = scmp.lt.s32.totalorder %s1809_s19, %s1805_s16 }
 0x2e5   : > { %p1807_p4 = pnand %p1806_p1, %p2034_p3  ;;  %p1812_p13 = por %p1811_p12, %p1810_p11 }
 0x2e7   : > { %v797_v37 = vpop.permute.xlu2 %796  ;;  %v758_v23 = vpop.permute.xlu1 %757  ;;  %p1808_p8 = pneg %p1807_p4 }
 0x2e8   : > { %v834_v25 = vmul.f32 %v811_v18, %v797_v37  ;;  %v828_v27 = vmul.f32 %v808_v46, %v758_v23  ;;  %v1151_v46 = vld [vmem:[#allocation4 + $0x50] sm:$0xff] }
 0x2e9   : > { %p1813_p0 = pnand %p1812_p13, %p1808_p8 }
 0x2ea   : > { %850 = vst.msk [vmem:[#allocation5 + $0x70] sm:$0xff] %vm444_vm2, %v834_v25 }
 0x2eb   : > { %844 = vst.msk [vmem:[#allocation5 + $0x40] sm:$0xff] %vm444_vm2, %v828_v27 }
 0x2ef   : > { %v771_v13 = vpop.permute.xlu1 %770 }
 0x2f0   : > { %v830_v38 = vmul.f32 %v809_v53, %v771_v13  ;;  %v1124_v53 = vld [vmem:[#allocation5 + $0x48] sm:$0xff]  ;;  %v998_v11 = vpop.permute.xlu2 %997 }
 0x2f1   : > { %v1126_v61 = vadd.f32 %v1124_v53, %v1121_v21  ;;  %v1222_v63 = vld [vmem:[#allocation5 + $0x70] sm:$0xff]  ;;  %v1005_v33 = vmul.f32 %v998_v11, %v2288_v0 }
 0x2f2   : > { %846 = vst.msk [vmem:[#allocation5 + $0x50] sm:$0xff] %vm444_vm2, %v830_v38  ;;  %v1123_v44 = vld [vmem:[#allocation5 + $0x40] sm:$0xff] }
 0x2f3   : > { %v2311_v45 = vadd.f32 %v1123_v44, %v1120_v12  ;;  %v1154_v2 = vmul.f32 %v1152_v59, %v1126_v61 }
 0x2f5   : > { %v1153_v26 = vmul.f32 %v1151_v46, %v2311_v45  ;;  %v2326_v3 = vadd.f32 %v1157_v58, %v1154_v2 }
 0x2f7   : > { %v1187_v7 = vmul.f32 %v1185_v36, %v2326_v3 }
 0x2f9   : > { %v1156_v22 = vld [vmem:[#allocation5 + $0x50] sm:$0xff] }
 0x2fa   : > { %v2314_v50 = vadd.f32 %v1156_v22, %v1153_v26 }
 0x2fc   : > { %v1186_v52 = vmul.f32 %v1184_v51, %v2314_v50 }
 0x2fe   : > { %v2317_v55 = vadd.f32 %v1189_v54, %v1186_v52 }
 0x2ff   : > { %v790_v56 = vpop.permute.xlu1 %789 }
 0x300   : > { %v833_v60 = vmul.f32 %v2272_v16, %v790_v56  ;;  %v1219_v62 = vmul.f32 %v1217_v57, %v2317_v55 }
 0x302   : > { %849 = vst.msk [vmem:[#allocation5 + $0x68] sm:$0xff] %vm444_vm2, %v833_v60  ;;  %v2322_v1 = vadd.f32 %v1222_v63, %v1219_v62 }
 0x304   : > { %1262 = vst.msk [vmem:[#allocation8] sm:$0xff] %vm444_vm2, %v2322_v1 }
 0x307   : > { %v803_v4 = vpop.permute.xlu1 %802 }
 0x308   : > { %v835_v6 = vmul.f32 %v811_v18, %v803_v4  ;;  %v1036_v18 = vpop.permute.xlu2 %1035 }
 0x309   : > { %v1190_v16 = vld [vmem:[#allocation5 + $0x68] sm:$0xff]  ;;  %v1039_v41 = vmul.f32 %v1036_v18, %v2304_v34 }
 0x30a   : > { %851 = vst.msk [vmem:[#allocation5 + $0x78] sm:$0xff] %vm444_vm2, %v835_v6  ;;  %v2330_v9 = vadd.f32 %v1190_v16, %v1187_v7 }
 0x30b   : > { %v1041_v34 = vsel %vm444_vm2, %v1039_v41, 0.0  ;;  %v1302_v41 = vld [vmem:[%s2447_s9 + $0x38] sm:$0xff] }
 0x30c   : > { %v1220_v37 = vmul.f32 %v1218_v14, %v2330_v9  ;;  %1314 = vmatpush.msra.mxu2 %v1302_v41 }
 0x310   : > { %v1031_v15 = vpop.permute.xlu1 %1030  ;;  %v1069_v43 = vpop.permute.xlu2 %1068 }
 0x311   : > { %v1223_v23 = vld [vmem:[#allocation5 + $0x78] sm:$0xff]  ;;  %v1038_v13 = vmul.f32 %v1031_v15, %v2292_v5  ;;  %v1072_v40 = vmul.f32 %v1069_v43, %v1060_v20 }
 0x312   : > { %v2333_v24 = vadd.f32 %v1223_v23, %v1220_v37 }
 0x313   : > { %v1003_v25 = vpop.permute.xlu0 %1002  ;;  %v1074_v5 = vsel %vm444_vm2, %v1072_v40, 0.0 }
 0x314   : > { %1263 = vst.msk [vmem:[#allocation8 + $0x8] sm:$0xff] %vm444_vm2, %v2333_v24  ;;  %v1006_v32 = vmul.f32 %v1003_v25, %v2296_v19  ;;  %v1007_v19 = vsel %vm444_vm2, %v1005_v33, 0.0 }
 0x316   : > { %v1008_v42 = vsel %vm444_vm2, %v1006_v32, 0.0 }
 0x317   : > { %v1009_v48 = vadd.f32 %v1008_v42, %v1007_v19  ;;  %v1301_v42 = vld [vmem:[%s2447_s9 + $0x30] sm:$0xff] }
 0x318   : > { %v1064_v27 = vpop.permute.xlu1 %1063  ;;  %1315 = vmatpush.msra.mxu2 %v1301_v42 }
 0x319   : > { %v1071_v31 = vmul.f32 %v1064_v27, %v2298_v29  ;;  %v1040_v29 = vsel %vm444_vm2, %v1038_v13, 0.0  ;;  %v1010_v51 = vrot.slane %v1009_v48, 4 }
 0x31a   : > { %v1130_v12 = vpop.permute.xlu2 %1129 }
 0x31b   : > { %v1097_v28 = vpop.permute.xlu0 %1096  ;;  %v1073_v46 = vsel %vm444_vm2, %v1071_v31, 0.0  ;;  %v1137_v20 = vmul.f32 %v1130_v12, %v2311_v45  ;;  %v1011_v56 = vadd.f32 %v1010_v51, %v1009_v48 }
 0x31c   : > { %v1104_v44 = vmul.f32 %v1097_v28, %v2306_v35  ;;  %v1075_v26 = vadd.f32 %v1074_v5, %v1073_v46  ;;  %v1042_v35 = vadd.f32 %v1041_v34, %v1040_v29  ;;  %v1300_v29 = vld [vmem:[%s2447_s9 + $0x28] sm:$0xff] }
 0x31d   : > { %v1139_v52 = vsel %vm444_vm2, %v1137_v20, 0.0  ;;  %v1012_v62 = vrot.slane %v1011_v56, 2  ;;  %v1299_v20 = vld [vmem:[%s2447_s9 + $0x20] sm:$0xff]  ;;  %1316 = vmatpush.msra.mxu2 %v1300_v29 }
 0x31e   : > { %v1106_v49 = vsel %vm444_vm2, %v1104_v44, 0.0  ;;  %v1076_v17 = vrot.slane %v1075_v26, 4  ;;  %v1043_v54 = vrot.slane %v1042_v35, 4 }
 0x31f   : > { %v1013_v36 = vadd.f32 %v1012_v62, %v1011_v56  ;;  %1317 = vmatpush.msra.mxu2 %v1299_v20  ;;  %v1295_v56 = vld [vmem:[%s2447_s9] sm:$0xff] }
 0x320   : > { %v1102_v30 = vpop.permute.xlu1 %1101  ;;  %v1077_v57 = vadd.f32 %v1076_v17, %v1075_v26  ;;  %v1044_v45 = vadd.f32 %v1043_v54, %v1042_v35 }
 0x321   : > { %v1105_v38 = vmul.f32 %v1102_v30, %v1093_v10  ;;  %v1014_v18 = vrot.slane %v1013_v36, 1 }
 0x322   : > { %v1168_v63 = vpop.permute.xlu2 %1167  ;;  %v1078_v59 = vrot.slane %v1077_v57, 2  ;;  %v1045_v2 = vrot.slane %v1044_v45, 2 }
 0x323   : > { %v1135_v39 = vpop.permute.xlu0 %1134  ;;  %v1107_v0 = vsel %vm444_vm2, %v1105_v38, 0.0  ;;  %v1171_v6 = vmul.f32 %v1168_v63, %v2326_v3  ;;  %v1015_v3 = vadd.f32 %v1014_v18, %v1013_v36 }
 0x324   : > { %v1138_v47 = vmul.f32 %v1135_v39, %v1126_v61  ;;  %v1108_v22 = vadd.f32 %v1107_v0, %v1106_v49  ;;  %v1079_v7 = vadd.f32 %v1078_v59, %v1077_v57  ;;  %v1046_v15 = vadd.f32 %v1045_v2, %v1044_v45 }
 0x325   : > { %v1173_v23 = vsel %vm444_vm2, %v1171_v6, 0.0 }
 0x326   : > { %v1140_v10 = vsel %vm444_vm2, %v1138_v47, 0.0  ;;  %v1109_v21 = vrot.slane %v1108_v22, 4  ;;  %v1080_v28 = vrot.slane %v1079_v7, 1  ;;  %v1047_v30 = vrot.slane %v1046_v15, 1 }
 0x327   : > { %v1141_v53 = vadd.f32 %v1140_v10, %v1139_v52  ;;  %v1297_v52 = vld [vmem:[%s2447_s9 + $0x10] sm:$0xff] }
 0x328   : > { %v1110_v61 = vadd.f32 %v1109_v21, %v1108_v22  ;;  %v1081_v13 = vadd.f32 %v1080_v28, %v1079_v7  ;;  %v1048_v39 = vadd.f32 %v1047_v30, %v1046_v15  ;;  %v1298_v22 = vld [vmem:[%s2447_s9 + $0x18] sm:$0xff]  ;;  %v1619_v15 = vld [vmem:[%s2446_s8] ss:$0 sm:$0xff] }
 0x329   : > { %v1142_v60 = vrot.slane %v1141_v53, 4  ;;  %1318 = vmatpush.msra.mxu2 %v1298_v22 }
 0x32a   : > { %v1111_v4 = vrot.slane %v1110_v61, 2  ;;  %v1248_v12 = vsel %vm1247_vm3, %v1015_v3, %v1048_v39  ;;  %v1229_v17 = vpop.permute.xlu2 %1228 }
 0x32b   : > { %v1143_v58 = vadd.f32 %v1142_v60, %v1141_v53  ;;  %v1196_v44 = vpop.permute.xlu0 %1195  ;;  %v1250_v47 = vsel %vm1249_vm4, %v1248_v12, %v1081_v13  ;;  %1319 = vmatpush.msra.mxu2 %v1297_v52  ;;  %v1236_v21 = vmul.f32 %v1229_v17, %v2322_v1 }
 0x32c   : > { %v1112_v37 = vadd.f32 %v1111_v4, %v1110_v61  ;;  %v1203_v48 = vmul.f32 %v1196_v44, %v2317_v55 }
 0x32d   : > { %v1144_v11 = vrot.slane %v1143_v58, 2  ;;  %v1238_v62 = vsel %vm444_vm2, %v1236_v21, 0.0 }
 0x32e   : > { %v1113_v32 = vrot.slane %v1112_v37, 1  ;;  %v1205_v51 = vsel %vm444_vm2, %v1203_v48, 0.0 }
 0x32f   : > { %v1145_v43 = vadd.f32 %v1144_v11, %v1143_v58 }
 0x331   : > { %v1146_v38 = vrot.slane %v1145_v43, 1 }
 0x333   : > { %v1147_v19 = vadd.f32 %v1146_v38, %v1145_v43  ;;  %v1668_v43 = vld [vmem:[%s2068_s29] sm:$0xff] }
 0x33a   : > { %v1163_v16 = vpop.permute.xlu1 %1162 }
 0x33b   : > { %v1170_v14 = vmul.f32 %v1163_v16, %v2314_v50  ;;  %v1114_v50 = vadd.f32 %v1113_v32, %v1112_v37  ;;  %v1269_v37 = vmul.f32 %v1619_v15, %v2150_v8 }
 0x33d   : > { %v1172_v25 = vsel %vm444_vm2, %v1170_v14, 0.0  ;;  %v1252_v0 = vsel %vm1251_vm5, %v1250_v47, %v1114_v50 }
 0x33e   : > { %v1174_v27 = vadd.f32 %v1173_v23, %v1172_v25  ;;  %v1254_v49 = vsel %vm1253_vm6, %v1252_v0, %v1147_v19 }
 0x340   : > { %v1175_v31 = vrot.slane %v1174_v27, 4 }
 0x342   : > { %v1176_v33 = vadd.f32 %v1175_v31, %v1174_v27 }
 0x344   : > { %v1177_v40 = vrot.slane %v1176_v33, 2 }
 0x346   : > { %v1178_v46 = vadd.f32 %v1177_v40, %v1176_v33 }
 0x348   : > { %v1179_v5 = vrot.slane %v1178_v46, 1 }
 0x34a   : > { %v1180_v34 = vadd.f32 %v1179_v5, %v1178_v46  ;;  %v1201_v26 = vpop.permute.xlu1 %1200 }
 0x34b   : > { %v1204_v35 = vmul.f32 %v1201_v26, %v2330_v9  ;;  %v1296_v9 = vld [vmem:[%s2447_s9 + $0x8] sm:$0xff] }
 0x34c   : > { %v1256_v10 = vsel %vm1255_vm7, %v1254_v49, %v1180_v34  ;;  %1320 = vmatpush.msra.mxu2 %v1296_v9 }
 0x34d   : > { %v1206_v55 = vsel %vm444_vm2, %v1204_v35, 0.0 }
 0x34e   : > { %v1207_v53 = vadd.f32 %v1206_v55, %v1205_v51  ;;  %1321 = vmatpush.msra.mxu2 %v1295_v56 }
 0x350   : > { %v1208_v54 = vrot.slane %v1207_v53, 4 }
 0x352   : > { %v1209_v57 = vadd.f32 %v1208_v54, %v1207_v53  ;;  %v1234_v60 = vpop.permute.xlu0 %1233  ;;  %v1292_v18 = vpop.permute.xlu1 %1291 }
 0x353   : > { %v1237_v45 = vmul.f32 %v1234_v60, %v2333_v24 }
 0x354   : > { %v1210_v61 = vrot.slane %v1209_v57, 2 }
 0x355   : > { %v1239_v63 = vsel %vm444_vm2, %v1237_v45, 0.0 }
 0x356   : > { %v1211_v59 = vadd.f32 %v1210_v61, %v1209_v57  ;;  %v1240_v58 = vadd.f32 %v1239_v63, %v1238_v62 }
 0x358   : > { %v1212_v2 = vrot.slane %v1211_v59, 1  ;;  %v1241_v4 = vrot.slane %v1240_v58, 4 }
 0x35a   : > { %v1213_v1 = vadd.f32 %v1212_v2, %v1211_v59  ;;  %v1242_v6 = vadd.f32 %v1241_v4, %v1240_v58 }
 0x35c   : > { %v1258_v36 = vsel %vm1257_vm8, %v1256_v10, %v1213_v1  ;;  %v1243_v16 = vrot.slane %v1242_v6, 2 }
 0x35e   : > { %v1244_v7 = vadd.f32 %v1243_v16, %v1242_v6 }
 0x360   : > { %v1245_v11 = vrot.slane %v1244_v7, 1 }
 0x362   : > { %v1246_v24 = vadd.f32 %v1245_v11, %v1244_v7 }
 0x364   : > { %v1260_v14 = vsel %vm1259_vm9, %v1258_v36, %v1246_v24 }
 0x365   : > { %1261 = vst.msk [vmem:[#allocation7] sm:$0xff] %vm444_vm2, %v1260_v14 }
 0x36c   : > { %v1264_v23 = vld [vmem:[#allocation7] sm:$0xff] }
 0x36d   : > { %v1270_v25 = vadd.f32 %v1269_v37, %v1264_v23 }
 0x36f   : > { %v1294_v27 = vmul.f32 %v1292_v18, %v1270_v25 }
 0x371   : > { %1484 = vmatmul.msk.f32.vlgmr.msra.gmra.mxu2 %vm444_vm2, %v1294_v27 }
 0x3f4   : > { %v1323_v28 = vpop.f32.mrf.mxu2 }
 0x3f5   : > { %v1324_v8 = vadd.f32 %v1668_v43, %v1323_v28 }
 0x3f7   : > { %1326 = vst.msk [vmem:[%s439_s30] sm:$0xff] %vm451_vm0, %v1324_v8 }
 0x3f8   : > { %1816 = shalt.err (!%p1813_p0)
}
 0x3f9   : > { %1503 = dma.vmem_to_hbm [thread:$0]  (%p2034_p3), %s1342_s4, 128, %s1344_s11, %s1328_s12  }
 0x3fa PF: > { %s2471_s1 = sld [smem:[#allocation22_spill]]  ;;  %p1520_p5 = pnand %p1473_p9, %p1994_p6 }
 0x3fc   : > { %p1521_p7 = pneg %p1520_p5 }
 0x400   : > { %s1355_s24 = sand.u32 1, %s2471_s1  }
 0x401   : > { %s1356_s21 = scalar_lea.sflag [#allocation11], %s1355_s24 }
 0x402   : > { %1854 = dma.done.wait (%p1521_p7), %s1356_s21, 128  }
 0x403   : > { %1856 = vsyncadd (%p1521_p7), %s1356_s21, 4294967168  ;;  %s28_s18 = sadd.s32 1, %s1879_s18   ;;  %s2473_s13 = smov %s1863_s14 }
 0x404   : > { %p25_p10 = scmp.ge.s32.totalorder %s28_s18, 4   ;;  %s2474_s14 = smov %s1867_s15 }
 0x405   : > { %s2475_s15 = smov %s2050_s22  ;;  %s2476_s16 = smov %s1875_s17 }
 0x406   : > { %s2477_s17 = smov %s2479_s7  ;;  %27 = sbr.rel (!%p25_p10) target bundleno = 12 (0xc), region = 138 }
 0x40b   :  { %1362 = vsyncpa [#allocation10], 1 }
 0x40c   :  { %1364 = vsyncpa [#allocation10 + $0x1], 1 }
 0x40d   :  { %1365 = vsyncpa [#allocation13], 1 }
 0x40e   :  { %1366 = vsyncpa [#allocation16], 1 }
 0x40f   :  { %1367 = vsyncpa [#allocation11], 1 }
 0x410   :  { %1369 = vsyncpa [#allocation11 + $0x1], 1 }

</bundles_post_ra>
